<compile_context>
chip_gen: v6e
topology: v6e:2x2x1
jax: 0.10.0
libtpu: 0.0.40
codegen_flags: <defaults>
</compile_context>

<pallas_src>
import jax
import jax.numpy as jnp
from jax import lax
from jax.experimental import pallas as pl
from jax.experimental.pallas import tpu as pltpu


# ----------------------------------------------------------------------------
# glue: dense 1-D linear interpolation matrix (align_corners=True)
# ----------------------------------------------------------------------------
def _interp_matrix(n_in: int, n_out: int) -> jnp.ndarray:
    """M of shape (n_out, n_in) s.t. (M @ v) is align_corners=True linear resize."""
    if n_out == 1:
        return jnp.zeros((1, n_in), jnp.float32).at[0, 0].set(1.0)
    src = jnp.arange(n_out, dtype=jnp.float32) * (float(n_in - 1) / float(n_out - 1))
    i0 = jnp.clip(jnp.floor(src), 0, n_in - 1).astype(jnp.int32)
    i1 = jnp.minimum(i0 + 1, n_in - 1)
    frac = src - i0.astype(jnp.float32)
    rows = jnp.arange(n_out)
    m = jnp.zeros((n_out, n_in), jnp.float32)
    m = m.at[rows, i0].add(1.0 - frac)
    m = m.at[rows, i1].add(frac)
    return m


# ----------------------------------------------------------------------------
# glue: spatial operator = bilinear resize + the 9 zero-padded 3x3-conv shifts,
# flattened and block-diagonal over the batch.  Data-independent (shapes only).
# Column layout of the result: [tap t = kh*3+kw][batch n][pixel p = i*W+j].
# ----------------------------------------------------------------------------
def _build_resize_shift_operator(N, Hg, Wg, H, W) -> jnp.ndarray:
    mh = _interp_matrix(Hg, H)                       # (H, Hg)
    mw = _interp_matrix(Wg, W)                       # (W, Wg)
    eye_n = jnp.eye(N, dtype=jnp.float32)
    blocks = []
    for kh in range(3):
        sh = jnp.eye(H, H, k=kh - 1, dtype=jnp.float32)     # row shift, zero pad
        mh_s = sh @ mh                                       # (H, Hg)
        for kw in range(3):
            sw = jnp.eye(W, W, k=kw - 1, dtype=jnp.float32)  # col shift, zero pad
            mw_s = sw @ mw                                   # (W, Wg)
            a_t = jnp.kron(mh_s, mw_s)                       # (H*W, Hg*Wg)
            blocks.append(jnp.kron(eye_n, a_t.T))            # (N*Hg*Wg, N*H*W)
    return jnp.concatenate(blocks, axis=1)                   # (N*Hg*Wg, 9*N*H*W)


# ----------------------------------------------------------------------------
# Pallas kernel
# ----------------------------------------------------------------------------
def _make_attblock_kernel(N, F_g, F_l, F_int, C_att, H, W, eps):
    NHW = N * H * W
    inv_cnt = 1.0 / float(NHW)

    def _bn_train(z, gamma, beta):
        # Single-pass training-mode BatchNorm over (N,H,W) (= the lane axis here):
        # sum and sum-of-squares in one sweep, biased variance, eps inside rsqrt.
        s = jnp.sum(z, axis=1, keepdims=True)
        ss = jnp.sum(z * z, axis=1, keepdims=True)
        mean = s * inv_cnt
        var = ss * inv_cnt - mean * mean
        inv = lax.rsqrt(var + eps)
        return (z - mean) * (inv * gamma) + beta

    def kernel(g_ref, bt_ref, wg_ref, gb_ref,
               x_ref, wx_ref, xb_ref,
               wpsi_ref, pb_ref, out_ref):
        # ---- Phase 1: bilinear resize of g + all 9 conv shifts: ONE MXU matmul.
        # g_ref: (F_g, N*Hg*Wg), bt_ref: (N*Hg*Wg, 9*N*H*W) -> taps (F_g, 9*NHW).
        taps = jnp.dot(g_ref[...], bt_ref[...], preferred_element_type=jnp.float32)

        # ---- Phase 2: W_g 3x3 conv = 9 accumulated channel-mixing matmuls.
        # Each slice starts at a multiple of NHW (multiple of 128) -> lane aligned.
        g1 = jnp.zeros((F_int, NHW), jnp.float32)
        for t in range(9):                                  # tiny fixed unroll
            g1 = g1 + jnp.dot(wg_ref[t], taps[:, t * NHW:(t + 1) * NHW],
                              preferred_element_type=jnp.float32)
        g1 = g1 + gb_ref[:, 0:1]                            # conv bias
        g1 = _bn_train(g1, gb_ref[:, 1:2], gb_ref[:, 2:3])  # BN (batch stats)

        # ---- Phase 3: W_x 1x1 conv (one matmul) + BN.
        x1 = jnp.dot(wx_ref[...], x_ref[...], preferred_element_type=jnp.float32)
        x1 = x1 + xb_ref[:, 0:1]
        x1 = _bn_train(x1, xb_ref[:, 1:2], xb_ref[:, 2:3])

        # ---- Phase 4: ReLU(g1+x1) -> psi 1x1 conv -> BN -> Sigmoid (lane-dense).
        psi = jnp.maximum(g1 + x1, 0.0)
        att = jnp.dot(wpsi_ref[...], psi, preferred_element_type=jnp.float32)
        att = att + pb_ref[:, 0:1]
        att = _bn_train(att, pb_ref[:, 1:2], pb_ref[:, 2:3])
        out_ref[...] = 1.0 / (1.0 + jnp.exp(-att))

    return kernel


# ----------------------------------------------------------------------------
# wrapper
# ----------------------------------------------------------------------------
def attblock_v4_forward(g, x, params, shape, eps=1e-5):
    N, F_g, Hg, Wg = g.shape
    Nx, F_l, H, W = x.shape
    assert Nx == N and (H, W) == tuple(shape)
    wg = params["wg_w"].astype(jnp.float32)          # (F_int, F_g, 3, 3)
    F_int = wg.shape[0]
    wpsi = params["psi_w"].astype(jnp.float32)       # (C_att, F_int)
    C_att = wpsi.shape[0]
    NHW = N * H * W

    # ---- layout plumbing / data-independent operator construction (plain JAX) ----
    bt = _build_resize_shift_operator(N, Hg, Wg, H, W)                    # (N*HgWg, 9*NHW)
    g_cm = jnp.transpose(g, (1, 0, 2, 3)).reshape(F_g, N * Hg * Wg).astype(jnp.float32)
    x_cm = jnp.transpose(x, (1, 0, 2, 3)).reshape(F_l, NHW).astype(jnp.float32)
    wg_taps = jnp.transpose(wg, (2, 3, 0, 1)).reshape(9, F_int, F_g)      # [kh*3+kw]
    wx = params["wx_w"].astype(jnp.float32)                               # (F_int, F_l)
    f32 = lambda a: a.astype(jnp.float32)
    gb = jnp.stack([f32(params["wg_b"]), f32(params["bng_gamma"]), f32(params["bng_beta"])], axis=1)
    xb = jnp.stack([f32(params["wx_b"]), f32(params["bnx_gamma"]), f32(params["bnx_beta"])], axis=1)
    pb = jnp.stack([f32(params["psi_b"]), f32(params["bnp_gamma"]), f32(params["bnp_beta"])], axis=1)

    kernel = _make_attblock_kernel(N, F_g, F_l, F_int, C_att, H, W, eps)

    def _full_spec(shp):
        zeros = (0,) * len(shp)
        return pl.BlockSpec(shp, lambda i, z=zeros: z)

    # NOTE(perf): BN needs whole-(N,H,W) statistics per channel, and at these toy
    # sizes a single fused invocation is fastest (per-step grid overhead ~0.35us
    # dominates any split).  For large `shape` (e.g. 400x400), switch to factored
    # per-axis interpolation matrices, tile the pixel axis with a "parallel" grid
    # axis (uses both TCs on v7x), and raise vmem_limit_bytes accordingly.
    out_cm = pl.pallas_call(
        kernel,
        out_shape=jax.ShapeDtypeStruct((C_att, NHW), jnp.float32),
        grid=(1,),
        in_specs=[
            _full_spec(g_cm.shape),     # g, channel-major, flattened pixels
            _full_spec(bt.shape),       # resize + 3x3-shift operator
            _full_spec(wg_taps.shape),  # (9, F_int, F_g) conv taps
            _full_spec(gb.shape),       # [bias, gamma, beta] for W_g branch
            _full_spec(x_cm.shape),     # x, channel-major, flattened pixels
            _full_spec(wx.shape),       # 1x1 conv weight
            _full_spec(xb.shape),       # [bias, gamma, beta] for W_x branch
            _full_spec(wpsi.shape),     # psi 1x1 conv weight
            _full_spec(pb.shape),       # [bias, gamma, beta] for psi branch
        ],
        out_specs=_full_spec((C_att, NHW)),     # lane-dense (512-wide) output slab
        compiler_params=pltpu.CompilerParams(dimension_semantics=("arbitrary",)),
    )(g_cm, bt, wg_taps, gb, x_cm, wx, xb, wpsi, pb)

    # back to NCHW
    return jnp.transpose(out_cm.reshape(C_att, N, H, W), (1, 0, 2, 3))


# ----------------------------------------------------------------------------
# pure-JAX reference (for correctness check only)
# ----------------------------------------------------------------------------
def attblock_v4_reference(g, x, params, shape, eps=1e-5):
    N, F_g, Hg, Wg = g.shape
    H, W = shape
    F_int = params["wg_w"].shape[0]
    mh = _interp_matrix(Hg, H)
    mw = _interp_matrix(Wg, W)

    def bn(y, gamma, beta):
        mean = y.mean(axis=(0, 2, 3), keepdims=True)
        var = ((y - mean) ** 2).mean(axis=(0, 2, 3), keepdims=True)
        return (y - mean) / jnp.sqrt(var + eps) * gamma[None, :, None, None] \
               + beta[None, :, None, None]

    g_up = jnp.einsum("ih,nchw,jw->ncij", mh, g.astype(jnp.float32), mw)
    gp = jnp.pad(g_up, ((0, 0), (0, 0), (1, 1), (1, 1)))
    g1 = jnp.zeros((N, F_int, H, W), jnp.float32)
    for kh in range(3):
        for kw in range(3):
            g1 = g1 + jnp.einsum("oc,nchw->nohw", params["wg_w"][:, :, kh, kw],
                                 gp[:, :, kh:kh + H, kw:kw + W])
    g1 = bn(g1 + params["wg_b"][None, :, None, None],
            params["bng_gamma"], params["bng_beta"])

    x1 = jnp.einsum("oc,nchw->nohw", params["wx_w"], x.astype(jnp.float32)) \
         + params["wx_b"][None, :, None, None]
    x1 = bn(x1, params["bnx_gamma"], params["bnx_beta"])

    psi = jnp.maximum(g1 + x1, 0.0)
    att = jnp.einsum("oc,nchw->nohw", params["psi_w"], psi) \
          + params["psi_b"][None, :, None, None]
    att = bn(att, params["bnp_gamma"], params["bnp_beta"])
    return jax.nn.sigmoid(att)


# ----------------------------------------------------------------------------
if __name__ == "__main__":
    N, F_g, F_l, F_int, C_att = 2, 4, 4, 8, 1
    Hg, Wg = 8, 8
    H, W = 16, 16            # shape; N*H*W = 512 (lane-dense, multiple of 128)

    key = jax.random.PRNGKey(0)
    k = jax.random.split(key, 14)
    g = jax.random.normal(k[0], (N, F_g, Hg, Wg), jnp.float32)
    x = jax.random.normal(k[1], (N, F_l, H, W), jnp.float32)
    params = {
        "wg_w": 0.2 * jax.random.normal(k[2], (F_int, F_g, 3, 3), jnp.float32),
        "wg_b": 0.1 * jax.random.normal(k[3], (F_int,), jnp.float32),
        "bng_gamma": 1.0 + 0.1 * jax.random.normal(k[4], (F_int,), jnp.float32),
        "bng_beta": 0.1 * jax.random.normal(k[5], (F_int,), jnp.float32),
        "wx_w": 0.3 * jax.random.normal(k[6], (F_int, F_l), jnp.float32),
        "wx_b": 0.1 * jax.random.normal(k[7], (F_int,), jnp.float32),
        "bnx_gamma": 1.0 + 0.1 * jax.random.normal(k[8], (F_int,), jnp.float32),
        "bnx_beta": 0.1 * jax.random.normal(k[9], (F_int,), jnp.float32),
        "psi_w": 0.3 * jax.random.normal(k[10], (C_att, F_int), jnp.float32),
        "psi_b": 0.1 * jax.random.normal(k[11], (C_att,), jnp.float32),
        "bnp_gamma": 1.0 + 0.1 * jax.random.normal(k[12], (C_att,), jnp.float32),
        "bnp_beta": 0.1 * jax.random.normal(k[13], (C_att,), jnp.float32),
    }

    out = attblock_v4_forward(g, x, params, shape=(H, W))
    out = jax.block_until_ready(out)
    assert out.shape == (N, C_att, H, W), out.shape

    ref = jax.block_until_ready(attblock_v4_reference(g, x, params, (H, W)))
    max_err = float(jnp.max(jnp.abs(out - ref)))
    assert max_err < 2e-3, f"max abs error too large: {max_err}"

    print("KERNEL_OK")
</pallas_src>

<mosaic_0001>
module attributes {stable_mosaic.version = 11 : i64} {
  func.func @kernel(%arg0: i32, %arg1: memref<4x128xf32, #tpu.memory_space<vmem>>, %arg2: memref<128x4608xf32, #tpu.memory_space<vmem>>, %arg3: memref<9x8x4xf32, #tpu.memory_space<vmem>>, %arg4: memref<8x3xf32, #tpu.memory_space<vmem>>, %arg5: memref<4x512xf32, #tpu.memory_space<vmem>>, %arg6: memref<8x4xf32, #tpu.memory_space<vmem>>, %arg7: memref<8x3xf32, #tpu.memory_space<vmem>>, %arg8: memref<1x8xf32, #tpu.memory_space<vmem>>, %arg9: memref<1x3xf32, #tpu.memory_space<vmem>>, %arg10: memref<1x512xf32, #tpu.memory_space<vmem>>) attributes {dimension_semantics = [#tpu.dimension_semantics<arbitrary>], iteration_bounds = array<i64: 1>, scalar_prefetch = 0 : i64, scratch_operands = 0 : i64, tpu.core_type = #tpu.core_type<tc>, window_params = [{pipeline_mode = #tpu.pipeline_mode<synchronous>, transform_indices = @transform_0, window_bounds = array<i64: 4, 128>}, {pipeline_mode = #tpu.pipeline_mode<synchronous>, transform_indices = @transform_1, window_bounds = array<i64: 128, 4608>}, {pipeline_mode = #tpu.pipeline_mode<synchronous>, transform_indices = @transform_2, window_bounds = array<i64: 9, 8, 4>}, {pipeline_mode = #tpu.pipeline_mode<synchronous>, transform_indices = @transform_3, window_bounds = array<i64: 8, 3>}, {pipeline_mode = #tpu.pipeline_mode<synchronous>, transform_indices = @transform_4, window_bounds = array<i64: 4, 512>}, {pipeline_mode = #tpu.pipeline_mode<synchronous>, transform_indices = @transform_5, window_bounds = array<i64: 8, 4>}, {pipeline_mode = #tpu.pipeline_mode<synchronous>, transform_indices = @transform_6, window_bounds = array<i64: 8, 3>}, {pipeline_mode = #tpu.pipeline_mode<synchronous>, transform_indices = @transform_7, window_bounds = array<i64: 1, 8>}, {pipeline_mode = #tpu.pipeline_mode<synchronous>, transform_indices = @transform_8, window_bounds = array<i64: 1, 3>}, {pipeline_mode = #tpu.pipeline_mode<synchronous>, transform_indices = @transform_9, window_bounds = array<i64: 1, 512>}]} {
    %c0 = arith.constant 0 : index
    %c0_0 = arith.constant 0 : index
    %0 = vector.load %arg1[%c0, %c0_0] : memref<4x128xf32, #tpu.memory_space<vmem>>, vector<4x128xf32>
    %c0_1 = arith.constant 0 : index
    %c0_2 = arith.constant 0 : index
    %1 = vector.load %arg2[%c0_1, %c0_2] : memref<128x4608xf32, #tpu.memory_space<vmem>>, vector<128x4608xf32>
    %cst = arith.constant dense<0.000000e+00> : vector<4x4608xf32>
    %2 = tpu.matmul %0, %1, %cst {dimension_numbers = #tpu.dot_dimension_numbers<[1], [0], [0], [1], [0, 0, 1, 1], [], []>} : vector<4x128xf32>, vector<128x4608xf32>, vector<4x4608xf32> -> vector<4x4608xf32>
    %cst_3 = arith.constant 0.000000e+00 : f32
    %3 = vector.broadcast %cst_3 : f32 to vector<8x512xf32>
    %c0_4 = arith.constant 0 : index
    %c0_5 = arith.constant 0 : index
    %c0_6 = arith.constant 0 : index
    %4 = vector.load %arg3[%c0_4, %c0_5, %c0_6] : memref<9x8x4xf32, #tpu.memory_space<vmem>>, vector<1x8x4xf32>
    %5 = vector.shape_cast %4 : vector<1x8x4xf32> to vector<8x4xf32>
    %6 = vector.extract_strided_slice %2 {offsets = [0, 0], sizes = [4, 512], strides = [1, 1]} : vector<4x4608xf32> to vector<4x512xf32>
    %cst_7 = arith.constant dense<0.000000e+00> : vector<8x512xf32>
    %7 = tpu.matmul %5, %6, %cst_7 {dimension_numbers = #tpu.dot_dimension_numbers<[1], [0], [0], [1], [0, 0, 1, 1], [], []>} : vector<8x4xf32>, vector<4x512xf32>, vector<8x512xf32> -> vector<8x512xf32>
    %8 = arith.addf %3, %7 : vector<8x512xf32>
    %c1 = arith.constant 1 : index
    %c0_8 = arith.constant 0 : index
    %c0_9 = arith.constant 0 : index
    %9 = vector.load %arg3[%c1, %c0_8, %c0_9] : memref<9x8x4xf32, #tpu.memory_space<vmem>>, vector<1x8x4xf32>
    %10 = vector.shape_cast %9 : vector<1x8x4xf32> to vector<8x4xf32>
    %11 = vector.extract_strided_slice %2 {offsets = [0, 512], sizes = [4, 512], strides = [1, 1]} : vector<4x4608xf32> to vector<4x512xf32>
    %cst_10 = arith.constant dense<0.000000e+00> : vector<8x512xf32>
    %12 = tpu.matmul %10, %11, %cst_10 {dimension_numbers = #tpu.dot_dimension_numbers<[1], [0], [0], [1], [0, 0, 1, 1], [], []>} : vector<8x4xf32>, vector<4x512xf32>, vector<8x512xf32> -> vector<8x512xf32>
    %13 = arith.addf %8, %12 : vector<8x512xf32>
    %c2 = arith.constant 2 : index
    %c0_11 = arith.constant 0 : index
    %c0_12 = arith.constant 0 : index
    %14 = vector.load %arg3[%c2, %c0_11, %c0_12] : memref<9x8x4xf32, #tpu.memory_space<vmem>>, vector<1x8x4xf32>
    %15 = vector.shape_cast %14 : vector<1x8x4xf32> to vector<8x4xf32>
    %16 = vector.extract_strided_slice %2 {offsets = [0, 1024], sizes = [4, 512], strides = [1, 1]} : vector<4x4608xf32> to vector<4x512xf32>
    %cst_13 = arith.constant dense<0.000000e+00> : vector<8x512xf32>
    %17 = tpu.matmul %15, %16, %cst_13 {dimension_numbers = #tpu.dot_dimension_numbers<[1], [0], [0], [1], [0, 0, 1, 1], [], []>} : vector<8x4xf32>, vector<4x512xf32>, vector<8x512xf32> -> vector<8x512xf32>
    %18 = arith.addf %13, %17 : vector<8x512xf32>
    %c3 = arith.constant 3 : index
    %c0_14 = arith.constant 0 : index
    %c0_15 = arith.constant 0 : index
    %19 = vector.load %arg3[%c3, %c0_14, %c0_15] : memref<9x8x4xf32, #tpu.memory_space<vmem>>, vector<1x8x4xf32>
    %20 = vector.shape_cast %19 : vector<1x8x4xf32> to vector<8x4xf32>
    %21 = vector.extract_strided_slice %2 {offsets = [0, 1536], sizes = [4, 512], strides = [1, 1]} : vector<4x4608xf32> to vector<4x512xf32>
    %cst_16 = arith.constant dense<0.000000e+00> : vector<8x512xf32>
    %22 = tpu.matmul %20, %21, %cst_16 {dimension_numbers = #tpu.dot_dimension_numbers<[1], [0], [0], [1], [0, 0, 1, 1], [], []>} : vector<8x4xf32>, vector<4x512xf32>, vector<8x512xf32> -> vector<8x512xf32>
    %23 = arith.addf %18, %22 : vector<8x512xf32>
    %c4 = arith.constant 4 : index
    %c0_17 = arith.constant 0 : index
    %c0_18 = arith.constant 0 : index
    %24 = vector.load %arg3[%c4, %c0_17, %c0_18] : memref<9x8x4xf32, #tpu.memory_space<vmem>>, vector<1x8x4xf32>
    %25 = vector.shape_cast %24 : vector<1x8x4xf32> to vector<8x4xf32>
    %26 = vector.extract_strided_slice %2 {offsets = [0, 2048], sizes = [4, 512], strides = [1, 1]} : vector<4x4608xf32> to vector<4x512xf32>
    %cst_19 = arith.constant dense<0.000000e+00> : vector<8x512xf32>
    %27 = tpu.matmul %25, %26, %cst_19 {dimension_numbers = #tpu.dot_dimension_numbers<[1], [0], [0], [1], [0, 0, 1, 1], [], []>} : vector<8x4xf32>, vector<4x512xf32>, vector<8x512xf32> -> vector<8x512xf32>
    %28 = arith.addf %23, %27 : vector<8x512xf32>
    %c5 = arith.constant 5 : index
    %c0_20 = arith.constant 0 : index
    %c0_21 = arith.constant 0 : index
    %29 = vector.load %arg3[%c5, %c0_20, %c0_21] : memref<9x8x4xf32, #tpu.memory_space<vmem>>, vector<1x8x4xf32>
    %30 = vector.shape_cast %29 : vector<1x8x4xf32> to vector<8x4xf32>
    %31 = vector.extract_strided_slice %2 {offsets = [0, 2560], sizes = [4, 512], strides = [1, 1]} : vector<4x4608xf32> to vector<4x512xf32>
    %cst_22 = arith.constant dense<0.000000e+00> : vector<8x512xf32>
    %32 = tpu.matmul %30, %31, %cst_22 {dimension_numbers = #tpu.dot_dimension_numbers<[1], [0], [0], [1], [0, 0, 1, 1], [], []>} : vector<8x4xf32>, vector<4x512xf32>, vector<8x512xf32> -> vector<8x512xf32>
    %33 = arith.addf %28, %32 : vector<8x512xf32>
    %c6 = arith.constant 6 : index
    %c0_23 = arith.constant 0 : index
    %c0_24 = arith.constant 0 : index
    %34 = vector.load %arg3[%c6, %c0_23, %c0_24] : memref<9x8x4xf32, #tpu.memory_space<vmem>>, vector<1x8x4xf32>
    %35 = vector.shape_cast %34 : vector<1x8x4xf32> to vector<8x4xf32>
    %36 = vector.extract_strided_slice %2 {offsets = [0, 3072], sizes = [4, 512], strides = [1, 1]} : vector<4x4608xf32> to vector<4x512xf32>
    %cst_25 = arith.constant dense<0.000000e+00> : vector<8x512xf32>
    %37 = tpu.matmul %35, %36, %cst_25 {dimension_numbers = #tpu.dot_dimension_numbers<[1], [0], [0], [1], [0, 0, 1, 1], [], []>} : vector<8x4xf32>, vector<4x512xf32>, vector<8x512xf32> -> vector<8x512xf32>
    %38 = arith.addf %33, %37 : vector<8x512xf32>
    %c7 = arith.constant 7 : index
    %c0_26 = arith.constant 0 : index
    %c0_27 = arith.constant 0 : index
    %39 = vector.load %arg3[%c7, %c0_26, %c0_27] : memref<9x8x4xf32, #tpu.memory_space<vmem>>, vector<1x8x4xf32>
    %40 = vector.shape_cast %39 : vector<1x8x4xf32> to vector<8x4xf32>
    %41 = vector.extract_strided_slice %2 {offsets = [0, 3584], sizes = [4, 512], strides = [1, 1]} : vector<4x4608xf32> to vector<4x512xf32>
    %cst_28 = arith.constant dense<0.000000e+00> : vector<8x512xf32>
    %42 = tpu.matmul %40, %41, %cst_28 {dimension_numbers = #tpu.dot_dimension_numbers<[1], [0], [0], [1], [0, 0, 1, 1], [], []>} : vector<8x4xf32>, vector<4x512xf32>, vector<8x512xf32> -> vector<8x512xf32>
    %43 = arith.addf %38, %42 : vector<8x512xf32>
    %c8 = arith.constant 8 : index
    %c0_29 = arith.constant 0 : index
    %c0_30 = arith.constant 0 : index
    %44 = vector.load %arg3[%c8, %c0_29, %c0_30] : memref<9x8x4xf32, #tpu.memory_space<vmem>>, vector<1x8x4xf32>
    %45 = vector.shape_cast %44 : vector<1x8x4xf32> to vector<8x4xf32>
    %46 = vector.extract_strided_slice %2 {offsets = [0, 4096], sizes = [4, 512], strides = [1, 1]} : vector<4x4608xf32> to vector<4x512xf32>
    %cst_31 = arith.constant dense<0.000000e+00> : vector<8x512xf32>
    %47 = tpu.matmul %45, %46, %cst_31 {dimension_numbers = #tpu.dot_dimension_numbers<[1], [0], [0], [1], [0, 0, 1, 1], [], []>} : vector<8x4xf32>, vector<4x512xf32>, vector<8x512xf32> -> vector<8x512xf32>
    %48 = arith.addf %43, %47 : vector<8x512xf32>
    %c0_32 = arith.constant 0 : index
    %c0_33 = arith.constant 0 : index
    %49 = vector.load %arg4[%c0_32, %c0_33] : memref<8x3xf32, #tpu.memory_space<vmem>>, vector<8x1xf32>
    %50 = vector.broadcast %49 : vector<8x1xf32> to vector<8x512xf32>
    %51 = arith.addf %48, %50 : vector<8x512xf32>
    %c0_34 = arith.constant 0 : index
    %c1_35 = arith.constant 1 : index
    %52 = vector.load %arg4[%c0_34, %c1_35] : memref<8x3xf32, #tpu.memory_space<vmem>>, vector<8x1xf32>
    %c0_36 = arith.constant 0 : index
    %c2_37 = arith.constant 2 : index
    %53 = vector.load %arg4[%c0_36, %c2_37] : memref<8x3xf32, #tpu.memory_space<vmem>>, vector<8x1xf32>
    %cst_38 = arith.constant dense<0.000000e+00> : vector<8xf32>
    %54 = vector.multi_reduction <add>, %51, %cst_38 [1] : vector<8x512xf32> to vector<8xf32>
    %55 = vector.shape_cast %54 : vector<8xf32> to vector<8x1xf32>
    %56 = arith.mulf %51, %51 : vector<8x512xf32>
    %cst_39 = arith.constant dense<0.000000e+00> : vector<8xf32>
    %57 = vector.multi_reduction <add>, %56, %cst_39 [1] : vector<8x512xf32> to vector<8xf32>
    %58 = vector.shape_cast %57 : vector<8xf32> to vector<8x1xf32>
    %cst_40 = arith.constant 0.001953125 : f32
    %59 = vector.broadcast %cst_40 : f32 to vector<8x1xf32>
    %60 = arith.mulf %55, %59 : vector<8x1xf32>
    %cst_41 = arith.constant 0.001953125 : f32
    %61 = vector.broadcast %cst_41 : f32 to vector<8x1xf32>
    %62 = arith.mulf %58, %61 : vector<8x1xf32>
    %63 = arith.mulf %60, %60 : vector<8x1xf32>
    %64 = arith.subf %62, %63 : vector<8x1xf32>
    %cst_42 = arith.constant 9.99999974E-6 : f32
    %65 = vector.broadcast %cst_42 : f32 to vector<8x1xf32>
    %66 = arith.addf %64, %65 : vector<8x1xf32>
    %67 = math.rsqrt %66 : vector<8x1xf32>
    %68 = vector.broadcast %60 : vector<8x1xf32> to vector<8x512xf32>
    %69 = arith.subf %51, %68 : vector<8x512xf32>
    %70 = arith.mulf %67, %52 : vector<8x1xf32>
    %71 = vector.broadcast %70 : vector<8x1xf32> to vector<8x512xf32>
    %72 = arith.mulf %69, %71 : vector<8x512xf32>
    %73 = vector.broadcast %53 : vector<8x1xf32> to vector<8x512xf32>
    %74 = arith.addf %72, %73 : vector<8x512xf32>
    %c0_43 = arith.constant 0 : index
    %c0_44 = arith.constant 0 : index
    %75 = vector.load %arg6[%c0_43, %c0_44] : memref<8x4xf32, #tpu.memory_space<vmem>>, vector<8x4xf32>
    %c0_45 = arith.constant 0 : index
    %c0_46 = arith.constant 0 : index
    %76 = vector.load %arg5[%c0_45, %c0_46] : memref<4x512xf32, #tpu.memory_space<vmem>>, vector<4x512xf32>
    %cst_47 = arith.constant dense<0.000000e+00> : vector<8x512xf32>
    %77 = tpu.matmul %75, %76, %cst_47 {dimension_numbers = #tpu.dot_dimension_numbers<[1], [0], [0], [1], [0, 0, 1, 1], [], []>} : vector<8x4xf32>, vector<4x512xf32>, vector<8x512xf32> -> vector<8x512xf32>
    %c0_48 = arith.constant 0 : index
    %c0_49 = arith.constant 0 : index
    %78 = vector.load %arg7[%c0_48, %c0_49] : memref<8x3xf32, #tpu.memory_space<vmem>>, vector<8x1xf32>
    %79 = vector.broadcast %78 : vector<8x1xf32> to vector<8x512xf32>
    %80 = arith.addf %77, %79 : vector<8x512xf32>
    %c0_50 = arith.constant 0 : index
    %c1_51 = arith.constant 1 : index
    %81 = vector.load %arg7[%c0_50, %c1_51] : memref<8x3xf32, #tpu.memory_space<vmem>>, vector<8x1xf32>
    %c0_52 = arith.constant 0 : index
    %c2_53 = arith.constant 2 : index
    %82 = vector.load %arg7[%c0_52, %c2_53] : memref<8x3xf32, #tpu.memory_space<vmem>>, vector<8x1xf32>
    %cst_54 = arith.constant dense<0.000000e+00> : vector<8xf32>
    %83 = vector.multi_reduction <add>, %80, %cst_54 [1] : vector<8x512xf32> to vector<8xf32>
    %84 = vector.shape_cast %83 : vector<8xf32> to vector<8x1xf32>
    %85 = arith.mulf %80, %80 : vector<8x512xf32>
    %cst_55 = arith.constant dense<0.000000e+00> : vector<8xf32>
    %86 = vector.multi_reduction <add>, %85, %cst_55 [1] : vector<8x512xf32> to vector<8xf32>
    %87 = vector.shape_cast %86 : vector<8xf32> to vector<8x1xf32>
    %cst_56 = arith.constant 0.001953125 : f32
    %88 = vector.broadcast %cst_56 : f32 to vector<8x1xf32>
    %89 = arith.mulf %84, %88 : vector<8x1xf32>
    %cst_57 = arith.constant 0.001953125 : f32
    %90 = vector.broadcast %cst_57 : f32 to vector<8x1xf32>
    %91 = arith.mulf %87, %90 : vector<8x1xf32>
    %92 = arith.mulf %89, %89 : vector<8x1xf32>
    %93 = arith.subf %91, %92 : vector<8x1xf32>
    %cst_58 = arith.constant 9.99999974E-6 : f32
    %94 = vector.broadcast %cst_58 : f32 to vector<8x1xf32>
    %95 = arith.addf %93, %94 : vector<8x1xf32>
    %96 = math.rsqrt %95 : vector<8x1xf32>
    %97 = vector.broadcast %89 : vector<8x1xf32> to vector<8x512xf32>
    %98 = arith.subf %80, %97 : vector<8x512xf32>
    %99 = arith.mulf %96, %81 : vector<8x1xf32>
    %100 = vector.broadcast %99 : vector<8x1xf32> to vector<8x512xf32>
    %101 = arith.mulf %98, %100 : vector<8x512xf32>
    %102 = vector.broadcast %82 : vector<8x1xf32> to vector<8x512xf32>
    %103 = arith.addf %101, %102 : vector<8x512xf32>
    %104 = arith.addf %74, %103 : vector<8x512xf32>
    %cst_59 = arith.constant 0.000000e+00 : f32
    %105 = vector.broadcast %cst_59 : f32 to vector<8x512xf32>
    %106 = arith.maximumf %104, %105 : vector<8x512xf32>
    %c0_60 = arith.constant 0 : index
    %c0_61 = arith.constant 0 : index
    %107 = vector.load %arg8[%c0_60, %c0_61] : memref<1x8xf32, #tpu.memory_space<vmem>>, vector<1x8xf32>
    %cst_62 = arith.constant dense<0.000000e+00> : vector<1x512xf32>
    %108 = tpu.matmul %107, %106, %cst_62 {dimension_numbers = #tpu.dot_dimension_numbers<[1], [0], [0], [1], [0, 0, 1, 1], [], []>} : vector<1x8xf32>, vector<8x512xf32>, vector<1x512xf32> -> vector<1x512xf32>
    %c0_63 = arith.constant 0 : index
    %c0_64 = arith.constant 0 : index
    %109 = vector.load %arg9[%c0_63, %c0_64] : memref<1x3xf32, #tpu.memory_space<vmem>>, vector<1x1xf32>
    %110 = vector.broadcast %109 : vector<1x1xf32> to vector<1x512xf32>
    %111 = arith.addf %108, %110 : vector<1x512xf32>
    %c0_65 = arith.constant 0 : index
    %c1_66 = arith.constant 1 : index
    %112 = vector.load %arg9[%c0_65, %c1_66] : memref<1x3xf32, #tpu.memory_space<vmem>>, vector<1x1xf32>
    %c0_67 = arith.constant 0 : index
    %c2_68 = arith.constant 2 : index
    %113 = vector.load %arg9[%c0_67, %c2_68] : memref<1x3xf32, #tpu.memory_space<vmem>>, vector<1x1xf32>
    %cst_69 = arith.constant dense<0.000000e+00> : vector<1xf32>
    %114 = vector.multi_reduction <add>, %111, %cst_69 [1] : vector<1x512xf32> to vector<1xf32>
    %115 = vector.shape_cast %114 : vector<1xf32> to vector<1x1xf32>
    %116 = arith.mulf %111, %111 : vector<1x512xf32>
    %cst_70 = arith.constant dense<0.000000e+00> : vector<1xf32>
    %117 = vector.multi_reduction <add>, %116, %cst_70 [1] : vector<1x512xf32> to vector<1xf32>
    %118 = vector.shape_cast %117 : vector<1xf32> to vector<1x1xf32>
    %cst_71 = arith.constant 0.001953125 : f32
    %119 = vector.broadcast %cst_71 : f32 to vector<1x1xf32>
    %120 = arith.mulf %115, %119 : vector<1x1xf32>
    %cst_72 = arith.constant 0.001953125 : f32
    %121 = vector.broadcast %cst_72 : f32 to vector<1x1xf32>
    %122 = arith.mulf %118, %121 : vector<1x1xf32>
    %123 = arith.mulf %120, %120 : vector<1x1xf32>
    %124 = arith.subf %122, %123 : vector<1x1xf32>
    %cst_73 = arith.constant 9.99999974E-6 : f32
    %125 = vector.broadcast %cst_73 : f32 to vector<1x1xf32>
    %126 = arith.addf %124, %125 : vector<1x1xf32>
    %127 = math.rsqrt %126 : vector<1x1xf32>
    %128 = vector.broadcast %120 : vector<1x1xf32> to vector<1x512xf32>
    %129 = arith.subf %111, %128 : vector<1x512xf32>
    %130 = arith.mulf %127, %112 : vector<1x1xf32>
    %131 = vector.broadcast %130 : vector<1x1xf32> to vector<1x512xf32>
    %132 = arith.mulf %129, %131 : vector<1x512xf32>
    %133 = vector.broadcast %113 : vector<1x1xf32> to vector<1x512xf32>
    %134 = arith.addf %132, %133 : vector<1x512xf32>
    %cst_74 = arith.constant 0.000000e+00 : f32
    %135 = vector.broadcast %cst_74 : f32 to vector<1x512xf32>
    %136 = arith.subf %135, %134 : vector<1x512xf32>
    %137 = math.exp %136 : vector<1x512xf32>
    %cst_75 = arith.constant 1.000000e+00 : f32
    %138 = vector.broadcast %cst_75 : f32 to vector<1x512xf32>
    %139 = arith.addf %138, %137 : vector<1x512xf32>
    %cst_76 = arith.constant 1.000000e+00 : f32
    %140 = vector.broadcast %cst_76 : f32 to vector<1x512xf32>
    %141 = arith.divf %140, %139 : vector<1x512xf32>
    %c0_77 = arith.constant 0 : index
    %c0_78 = arith.constant 0 : index
    %142 = vector.load %arg10[%c0_77, %c0_78] : memref<1x512xf32, #tpu.memory_space<vmem>>, vector<1x512xf32>
    tpu.vector_store %arg10[%c0_77, %c0_78], %141 {strides = array<i32>} : memref<1x512xf32, #tpu.memory_space<vmem>>, vector<1x512xf32>,
    return
  }
  func.func @transform_0(%arg0: i32) -> (i32, i32) {
    %c0_i32 = arith.constant 0 : i32
    %c0_i32_0 = arith.constant 0 : i32
    %c0_i32_1 = arith.constant 0 : i32
    return %c0_i32, %c0_i32_0 : i32, i32
  }
  func.func @transform_1(%arg0: i32) -> (i32, i32) {
    %c0_i32 = arith.constant 0 : i32
    %c0_i32_0 = arith.constant 0 : i32
    %c0_i32_1 = arith.constant 0 : i32
    return %c0_i32, %c0_i32_0 : i32, i32
  }
  func.func @transform_2(%arg0: i32) -> (i32, i32, i32) {
    %c0_i32 = arith.constant 0 : i32
    %c0_i32_0 = arith.constant 0 : i32
    %c0_i32_1 = arith.constant 0 : i32
    %c0_i32_2 = arith.constant 0 : i32
    return %c0_i32, %c0_i32_0, %c0_i32_1 : i32, i32, i32
  }
  func.func @transform_3(%arg0: i32) -> (i32, i32) {
    %c0_i32 = arith.constant 0 : i32
    %c0_i32_0 = arith.constant 0 : i32
    %c0_i32_1 = arith.constant 0 : i32
    return %c0_i32, %c0_i32_0 : i32, i32
  }
  func.func @transform_4(%arg0: i32) -> (i32, i32) {
    %c0_i32 = arith.constant 0 : i32
    %c0_i32_0 = arith.constant 0 : i32
    %c0_i32_1 = arith.constant 0 : i32
    return %c0_i32, %c0_i32_0 : i32, i32
  }
  func.func @transform_5(%arg0: i32) -> (i32, i32) {
    %c0_i32 = arith.constant 0 : i32
    %c0_i32_0 = arith.constant 0 : i32
    %c0_i32_1 = arith.constant 0 : i32
    return %c0_i32, %c0_i32_0 : i32, i32
  }
  func.func @transform_6(%arg0: i32) -> (i32, i32) {
    %c0_i32 = arith.constant 0 : i32
    %c0_i32_0 = arith.constant 0 : i32
    %c0_i32_1 = arith.constant 0 : i32
    return %c0_i32, %c0_i32_0 : i32, i32
  }
  func.func @transform_7(%arg0: i32) -> (i32, i32) {
    %c0_i32 = arith.constant 0 : i32
    %c0_i32_0 = arith.constant 0 : i32
    %c0_i32_1 = arith.constant 0 : i32
    return %c0_i32, %c0_i32_0 : i32, i32
  }
  func.func @transform_8(%arg0: i32) -> (i32, i32) {
    %c0_i32 = arith.constant 0 : i32
    %c0_i32_0 = arith.constant 0 : i32
    %c0_i32_1 = arith.constant 0 : i32
    return %c0_i32, %c0_i32_0 : i32, i32
  }
  func.func @transform_9(%arg0: i32) -> (i32, i32) {
    %c0_i32 = arith.constant 0 : i32
    %c0_i32_0 = arith.constant 0 : i32
    %c0_i32_1 = arith.constant 0 : i32
    return %c0_i32, %c0_i32_0 : i32, i32
  }
}

</mosaic_0001>

<bundles_post_ra>
// kernel: tpu_custom_call.1
= control target key start
LH: loop header
LB: loop body
LE: loop exit
PB: predicated region body
PF: predicated region fallthrough
CT: control target
= control target key end

     0   :  { %14 = vsyncpa [#allocation3], 0  ;;  %s4530_s0 = inlined_call_operand.hbm [shape: f32[4,128], index: 0, kind: input, shape index: {}]   ;;  %s4531_s1 = inlined_call_operand.hbm [shape: f32[128,4608], index: 1, kind: input, shape index: {}]   ;;  %s4532_s2 = inlined_call_operand.vmem [shape: f32[9,8,4], index: 2, kind: input, shape index: {}]   ;;  %s4533_s3 = inlined_call_operand.vmem [shape: f32[8,3], index: 3, kind: input, shape index: {}]   ;;  %s4534_s4 = inlined_call_operand.hbm [shape: f32[4,512], index: 4, kind: input, shape index: {}]   ;;  %s4535_s5 = inlined_call_operand.vmem [shape: f32[8,4], index: 5, kind: input, shape index: {}]   ;;  %s4536_s6 = inlined_call_operand.vmem [shape: f32[8,3], index: 6, kind: input, shape index: {}]   ;;  %s4537_s7 = inlined_call_operand.hbm [shape: f32[1,8], index: 7, kind: input, shape index: {}]   ;;  %s4538_s8 = inlined_call_operand.hbm [shape: f32[1,3], index: 8, kind: input, shape index: {}]   ;;  %s4539_s9 = inlined_call_operand.hbm [shape: f32[1,512], index: 9, kind: output, shape index: {}]  }
   0x1   :  { %15 = vsyncpa [#allocation6], 0 }
   0x2   :  { %16 = vsyncpa [#allocation9], 0 }
   0x3   :  { %17 = vsyncpa [#allocation4], 0  ;;  %s4215_s30 = smov [#allocation5]  }
   0x4   :  { %s33_s10 = sshll.u32 %s4215_s30, 4  ;;  %s34_s10 = int_to_ptr.vmem [resolvable:$true] %s33_s10 }
   0x5   :  { %s4095_s11 = scalar_lea.vmem %s34_s10, 73728  ;;  %p4100_p1 = scmp.lt.s32.totalorder %s34_s10, %s34_s10 }
   0x6   :  { %p4096_p0 = scmp.ne.s32.totalorder %s34_s10, %s4095_s11  ;;  %p4101_p2 = scmp.lt.s32.totalorder %s4095_s11, %s4095_s11 }
   0x8   :  { %p4102_p3 = por %p4101_p2, %p4100_p1 }
   0xa   :  { %p4103_p4 = pnand %p4102_p3, %p4096_p0 }
   0xc   :  { %4106 = shalt.err (!%p4103_p4)
}
   0xd   :  { %s4216_s12 = smov 4608   ;;  %s4217_s13 = smov 288  }
   0xe   :  { %39 = dma.hbm_to_vmem [thread:$0]  %s4531_s1, 73728, %s34_s10, [#allocation6], %s4216_s12, %s4216_s12, %s4217_s13  }
   0xf   :  { %s4218_s16 = smov [#allocation8]   ;;  %s4219_s18 = smov [#allocation2]  }
  0x10   :  { %s64_s17 = sshll.u32 %s4218_s16, 4  ;;  %s24_s19 = sshll.u32 %s4219_s18, 4  ;;  %s65_s17 = int_to_ptr.vmem [resolvable:$true] %s64_s17  ;;  %s25_s19 = int_to_ptr.vmem [resolvable:$true] %s24_s19 }
  0x11   :  { %s4115_s20 = scalar_lea.vmem %s65_s17, 16  ;;  %s4119_s21 = scalar_lea.vmem %s65_s17, 32 }
  0x12   :  { %p4116_p5 = scmp.ne.s32.totalorder %s65_s17, %s4115_s20  ;;  %p4120_p6 = scmp.lt.s32.totalorder %s65_s17, %s65_s17 }
  0x13   :  { %p4121_p7 = scmp.lt.s32.totalorder %s4119_s21, %s4115_s20 }
  0x15   :  { %p4122_p8 = por %p4121_p7, %p4120_p6 }
  0x17   :  { %p4123_p9 = pnand %p4122_p8, %p4116_p5 }
  0x19   :  { %4126 = shalt.err (!%p4123_p9)
}
  0x1a   :  { %67 = dma.hbm_to_vmem [thread:$0]  %s4537_s7, 16, %s65_s17, [#allocation9]  }
  0x1b   :  { %s4135_s24 = scalar_lea.vmem %s25_s19, 64  ;;  %p4140_p11 = scmp.lt.s32.totalorder %s25_s19, %s25_s19 }
  0x1c   :  { %p4136_p10 = scmp.ne.s32.totalorder %s25_s19, %s4135_s24  ;;  %p4141_p12 = scmp.lt.s32.totalorder %s4135_s24, %s4135_s24 }
  0x1e   :  { %p4142_p13 = por %p4141_p12, %p4140_p11 }
  0x20   :  { %p4143_p0 = pnand %p4142_p13, %p4136_p10 }
  0x22   :  { %4146 = shalt.err (!%p4143_p0)
}
  0x23   :  { %27 = dma.hbm_to_vmem [thread:$0]  %s4530_s0, 64, %s25_s19, [#allocation3]  }
  0x24   :  { %s4220_s26 = smov [#allocation7]   ;;  %s4221_s28 = smov [#allocation10]  }
  0x25   :  { %s50_s27 = sshll.u32 %s4220_s26, 4  ;;  %s74_s29 = sshll.u32 %s4221_s28, 4  ;;  %s51_s27 = int_to_ptr.vmem [resolvable:$true] %s50_s27  ;;  %s75_s29 = int_to_ptr.vmem [resolvable:$true] %s74_s29 }
  0x26   :  { %s4155_s30 = scalar_lea.vmem %s51_s27, 256  ;;  %p4160_p2 = scmp.lt.s32.totalorder %s51_s27, %s51_s27 }
  0x27   :  { %p4156_p1 = scmp.ne.s32.totalorder %s51_s27, %s4155_s30  ;;  %p4161_p3 = scmp.lt.s32.totalorder %s4155_s30, %s4155_s30 }
  0x29   :  { %p4162_p4 = por %p4161_p3, %p4160_p2 }
  0x2b   :  { %p4163_p5 = pnand %p4162_p4, %p4156_p1 }
  0x2d   :  { %4166 = shalt.err (!%p4163_p5)
}
  0x2e   :  { %53 = dma.hbm_to_vmem [thread:$0]  %s4534_s4, 256, %s51_s27, [#allocation6]  }
  0x2f   :  { %s4175_s11 = scalar_lea.vmem %s75_s29, 16  ;;  %s4179_s0 = scalar_lea.vmem %s75_s29, 32 }
  0x30   :  { %p4176_p6 = scmp.ne.s32.totalorder %s75_s29, %s4175_s11  ;;  %p4180_p7 = scmp.lt.s32.totalorder %s75_s29, %s75_s29 }
  0x31   :  { %p4181_p8 = scmp.lt.s32.totalorder %s4179_s0, %s4175_s11 }
  0x33   :  { %p4182_p9 = por %p4181_p8, %p4180_p7 }
  0x35   :  { %p4183_p10 = pnand %p4182_p9, %p4176_p6 }
  0x37   :  { %4186 = shalt.err (!%p4183_p10)
}
  0x38   :  { %77 = dma.hbm_to_vmem [thread:$0]  %s4538_s8, 16, %s75_s29, [#allocation9]  }
  0x39   :  { %4207 = dma.done.wait [#allocation3], 64  }
  0x3a   :  { %4208 = vsyncadd [#allocation3], 4294967232 }
  0x3b   :  { %4209 = dma.done.wait [#allocation6], 73984  }
  0x3c   :  { %4210 = vsyncadd [#allocation6], 4294893312 }
  0x3d   :  { %4211 = dma.done.wait [#allocation9], 32  }
  0x3e   :  { %4212 = vsyncadd [#allocation9], 4294967264  ;;  %v4222_v0 = vmov 0.0   ;;  %v635_v1 = vld [vmem:[#allocation5 + $0x10e8] sm:$0xff]  ;;  %v637_v2 = vld [vmem:[#allocation5 + $0x10f8] sm:$0xff]  ;;  %vm1955_vm0 = vcmask 1043456  }
  0x3f   :  { %734 = vmatprep.mubr.f32.mxu0 %v4222_v0  ;;  %805 = vmatprep.mubr.f32.mxu1 %v4222_v0  ;;  %v634_v3 = vld [vmem:[#allocation5 + $0x10e0] sm:$0xff]  ;;  %v636_v4 = vld [vmem:[#allocation5 + $0x10f0] sm:$0xff]  ;;  %v599_v5 = vld [vmem:[#allocation5 + $0xfc8] sm:$0xff]  ;;  %vm1951_vm1 = vcmask 31744   ;;  %vm3689_vm2 = vcmask 64512   ;;  %vm3835_vm3 = vcmask 1040384  }
  0x40   :  { %670 = vmatprep.subr.mxu0 %v635_v1  ;;  %741 = vmatprep.subr.mxu1 %v637_v2  ;;  %v601_v6 = vld [vmem:[#allocation5 + $0xfd8] sm:$0xff]  ;;  %v598_v7 = vld [vmem:[#allocation5 + $0xfc0] sm:$0xff]  ;;  %v600_v8 = vld [vmem:[#allocation5 + $0xfd0] sm:$0xff]  ;;  %s4228_s10 = smov [#allocation11]  }
  0x41   :  { %671 = vmatpush1.msra.mxu0 %v634_v3  ;;  %742 = vmatpush1.msra.mxu1 %v636_v4  ;;  %v563_v9 = vld [vmem:[#allocation5 + $0xea8] sm:$0xff]  ;;  %v565_v10 = vld [vmem:[#allocation5 + $0xeb8] sm:$0xff]  ;;  %v562_v11 = vld [vmem:[#allocation5 + $0xea0] sm:$0xff]  ;;  %s3961_s11 = sshll.u32 %s4228_s10, 4  ;;  %s3962_s11 = int_to_ptr.vmem [resolvable:$true] %s3961_s11 }
  0x42   :  { %672 = vmatprep.subr.mxu0 %v599_v5  ;;  %743 = vmatprep.subr.mxu1 %v601_v6  ;;  %v564_v12 = vld [vmem:[#allocation5 + $0xeb0] sm:$0xff]  ;;  %v527_v13 = vld [vmem:[#allocation5 + $0xd88] sm:$0xff]  ;;  %v529_v14 = vld [vmem:[#allocation5 + $0xd98] sm:$0xff]  ;;  %s4187_s0 = scalar_lea.vmem %s3962_s11, 64  ;;  %p4192_p12 = scmp.lt.s32.totalorder %s3962_s11, %s3962_s11 }
  0x43   :  { %673 = vmatpush1.msra.mxu0 %v598_v7  ;;  %744 = vmatpush1.msra.mxu1 %v600_v8  ;;  %v526_v15 = vld [vmem:[#allocation5 + $0xd80] sm:$0xff]  ;;  %v528_v16 = vld [vmem:[#allocation5 + $0xd90] sm:$0xff]  ;;  %v491_v17 = vld [vmem:[#allocation5 + $0xc68] sm:$0xff]  ;;  %p4188_p11 = scmp.ne.s32.totalorder %s3962_s11, %s4187_s0  ;;  %p4193_p13 = scmp.lt.s32.totalorder %s4187_s0, %s4187_s0 }
  0x44   :  { %674 = vmatprep.subr.mxu0 %v563_v9  ;;  %745 = vmatprep.subr.mxu1 %v565_v10  ;;  %v493_v18 = vld [vmem:[#allocation5 + $0xc78] sm:$0xff]  ;;  %v490_v19 = vld [vmem:[#allocation5 + $0xc60] sm:$0xff]  ;;  %v492_v20 = vld [vmem:[#allocation5 + $0xc70] sm:$0xff] }
  0x45   :  { %675 = vmatpush1.msra.mxu0 %v562_v11  ;;  %746 = vmatpush1.msra.mxu1 %v564_v12  ;;  %v455_v21 = vld [vmem:[#allocation5 + $0xb48] sm:$0xff]  ;;  %v457_v22 = vld [vmem:[#allocation5 + $0xb58] sm:$0xff]  ;;  %v454_v23 = vld [vmem:[#allocation5 + $0xb40] sm:$0xff]  ;;  %p4194_p0 = por %p4193_p13, %p4192_p12 }
  0x46   :  { %676 = vmatprep.subr.mxu0 %v527_v13  ;;  %747 = vmatprep.subr.mxu1 %v529_v14  ;;  %v456_v24 = vld [vmem:[#allocation5 + $0xb50] sm:$0xff]  ;;  %v419_v25 = vld [vmem:[#allocation5 + $0xa28] sm:$0xff]  ;;  %v421_v26 = vld [vmem:[#allocation5 + $0xa38] sm:$0xff] }
  0x47   :  { %677 = vmatpush1.msra.mxu0 %v526_v15  ;;  %748 = vmatpush1.msra.mxu1 %v528_v16  ;;  %v418_v27 = vld [vmem:[#allocation5 + $0xa20] sm:$0xff]  ;;  %v420_v28 = vld [vmem:[#allocation5 + $0xa30] sm:$0xff]  ;;  %v383_v29 = vld [vmem:[#allocation5 + $0x908] sm:$0xff]  ;;  %p4195_p1 = pnand %p4194_p0, %p4188_p11 }
  0x48   :  { %678 = vmatprep.subr.mxu0 %v491_v17  ;;  %749 = vmatprep.subr.mxu1 %v493_v18  ;;  %v385_v30 = vld [vmem:[#allocation5 + $0x918] sm:$0xff]  ;;  %v382_v31 = vld [vmem:[#allocation5 + $0x900] sm:$0xff]  ;;  %v384_v32 = vld [vmem:[#allocation5 + $0x910] sm:$0xff] }
  0x49   :  { %679 = vmatpush1.msra.mxu0 %v490_v19  ;;  %750 = vmatpush1.msra.mxu1 %v492_v20  ;;  %v347_v33 = vld [vmem:[#allocation5 + $0x7e8] sm:$0xff]  ;;  %v349_v34 = vld [vmem:[#allocation5 + $0x7f8] sm:$0xff]  ;;  %v346_v35 = vld [vmem:[#allocation5 + $0x7e0] sm:$0xff] }
  0x4a   :  { %680 = vmatprep.subr.mxu0 %v455_v21  ;;  %751 = vmatprep.subr.mxu1 %v457_v22  ;;  %v348_v36 = vld [vmem:[#allocation5 + $0x7f0] sm:$0xff]  ;;  %v311_v37 = vld [vmem:[#allocation5 + $0x6c8] sm:$0xff]  ;;  %v313_v38 = vld [vmem:[#allocation5 + $0x6d8] sm:$0xff] }
  0x4b   :  { %681 = vmatpush1.msra.mxu0 %v454_v23  ;;  %752 = vmatpush1.msra.mxu1 %v456_v24  ;;  %v310_v39 = vld [vmem:[#allocation5 + $0x6c0] sm:$0xff]  ;;  %v312_v40 = vld [vmem:[#allocation5 + $0x6d0] sm:$0xff]  ;;  %v275_v41 = vld [vmem:[#allocation5 + $0x5a8] sm:$0xff] }
  0x4c   :  { %682 = vmatprep.subr.mxu0 %v419_v25  ;;  %753 = vmatprep.subr.mxu1 %v421_v26  ;;  %v277_v42 = vld [vmem:[#allocation5 + $0x5b8] sm:$0xff]  ;;  %v274_v43 = vld [vmem:[#allocation5 + $0x5a0] sm:$0xff]  ;;  %v276_v44 = vld [vmem:[#allocation5 + $0x5b0] sm:$0xff] }
  0x4d   :  { %683 = vmatpush1.msra.mxu0 %v418_v27  ;;  %754 = vmatpush1.msra.mxu1 %v420_v28  ;;  %v239_v45 = vld [vmem:[#allocation5 + $0x488] sm:$0xff]  ;;  %v241_v46 = vld [vmem:[#allocation5 + $0x498] sm:$0xff]  ;;  %v238_v47 = vld [vmem:[#allocation5 + $0x480] sm:$0xff] }
  0x4e   :  { %684 = vmatprep.subr.mxu0 %v383_v29  ;;  %755 = vmatprep.subr.mxu1 %v385_v30  ;;  %v240_v48 = vld [vmem:[#allocation5 + $0x490] sm:$0xff]  ;;  %v203_v49 = vld [vmem:[#allocation5 + $0x368] sm:$0xff]  ;;  %v205_v50 = vld [vmem:[#allocation5 + $0x378] sm:$0xff] }
  0x4f   :  { %685 = vmatpush1.msra.mxu0 %v382_v31  ;;  %756 = vmatpush1.msra.mxu1 %v384_v32  ;;  %v202_v51 = vld [vmem:[#allocation5 + $0x360] sm:$0xff]  ;;  %v204_v52 = vld [vmem:[#allocation5 + $0x370] sm:$0xff]  ;;  %v167_v53 = vld [vmem:[#allocation5 + $0x248] sm:$0xff] }
  0x50   :  { %686 = vmatprep.subr.mxu0 %v347_v33  ;;  %757 = vmatprep.subr.mxu1 %v349_v34  ;;  %v169_v54 = vld [vmem:[#allocation5 + $0x258] sm:$0xff]  ;;  %v166_v55 = vld [vmem:[#allocation5 + $0x240] sm:$0xff]  ;;  %v168_v56 = vld [vmem:[#allocation5 + $0x250] sm:$0xff] }
  0x51   :  { %687 = vmatpush1.msra.mxu0 %v346_v35  ;;  %758 = vmatpush1.msra.mxu1 %v348_v36  ;;  %v131_v57 = vld [vmem:[#allocation5 + $0x128] sm:$0xff]  ;;  %v133_v58 = vld [vmem:[#allocation5 + $0x138] sm:$0xff]  ;;  %v130_v59 = vld [vmem:[#allocation5 + $0x120] sm:$0xff] }
  0x52   :  { %688 = vmatprep.subr.mxu0 %v311_v37  ;;  %759 = vmatprep.subr.mxu1 %v313_v38  ;;  %v132_v60 = vld [vmem:[#allocation5 + $0x130] sm:$0xff]  ;;  %v95_v61 = vld [vmem:[#allocation5 + $0x8] sm:$0xff]  ;;  %v97_v62 = vld [vmem:[#allocation5 + $0x18] sm:$0xff] }
  0x53   :  { %689 = vmatpush1.msra.mxu0 %v310_v39  ;;  %760 = vmatpush1.msra.mxu1 %v312_v40  ;;  %v94_v63 = vld [vmem:[#allocation5] sm:$0xff]  ;;  %v96_v1 = vld [vmem:[#allocation5 + $0x10] sm:$0xff]  ;;  %v4296_v2 = vld [vmem:[#allocation2] sm:$0xf] }
  0x54   :  { %690 = vmatprep.subr.mxu0 %v275_v41  ;;  %761 = vmatprep.subr.mxu1 %v277_v42  ;;  %v639_v3 = vld [vmem:[#allocation5 + $0x1108] sm:$0xff]  ;;  %v641_v4 = vld [vmem:[#allocation5 + $0x1118] sm:$0xff]  ;;  %v638_v5 = vld [vmem:[#allocation5 + $0x1100] sm:$0xff] }
  0x55   :  { %691 = vmatpush1.msra.mxu0 %v274_v43  ;;  %762 = vmatpush1.msra.mxu1 %v276_v44  ;;  %v640_v6 = vld [vmem:[#allocation5 + $0x1110] sm:$0xff]  ;;  %v603_v7 = vld [vmem:[#allocation5 + $0xfe8] sm:$0xff]  ;;  %v605_v8 = vld [vmem:[#allocation5 + $0xff8] sm:$0xff] }
  0x56   :  { %692 = vmatprep.subr.mxu0 %v239_v45  ;;  %763 = vmatprep.subr.mxu1 %v241_v46  ;;  %v602_v9 = vld [vmem:[#allocation5 + $0xfe0] sm:$0xff]  ;;  %v604_v10 = vld [vmem:[#allocation5 + $0xff0] sm:$0xff]  ;;  %v567_v11 = vld [vmem:[#allocation5 + $0xec8] sm:$0xff] }
  0x57   :  { %693 = vmatpush1.msra.mxu0 %v238_v47  ;;  %764 = vmatpush1.msra.mxu1 %v240_v48  ;;  %v569_v12 = vld [vmem:[#allocation5 + $0xed8] sm:$0xff]  ;;  %v566_v13 = vld [vmem:[#allocation5 + $0xec0] sm:$0xff]  ;;  %v568_v14 = vld [vmem:[#allocation5 + $0xed0] sm:$0xff] }
  0x58   :  { %694 = vmatprep.subr.mxu0 %v203_v49  ;;  %765 = vmatprep.subr.mxu1 %v205_v50  ;;  %v531_v15 = vld [vmem:[#allocation5 + $0xda8] sm:$0xff]  ;;  %v533_v16 = vld [vmem:[#allocation5 + $0xdb8] sm:$0xff]  ;;  %v530_v17 = vld [vmem:[#allocation5 + $0xda0] sm:$0xff] }
  0x59   :  { %695 = vmatpush1.msra.mxu0 %v202_v51  ;;  %766 = vmatpush1.msra.mxu1 %v204_v52  ;;  %v532_v18 = vld [vmem:[#allocation5 + $0xdb0] sm:$0xff]  ;;  %v495_v19 = vld [vmem:[#allocation5 + $0xc88] sm:$0xff]  ;;  %v497_v20 = vld [vmem:[#allocation5 + $0xc98] sm:$0xff] }
  0x5a   :  { %696 = vmatprep.subr.mxu0 %v167_v53  ;;  %767 = vmatprep.subr.mxu1 %v169_v54  ;;  %v494_v21 = vld [vmem:[#allocation5 + $0xc80] sm:$0xff]  ;;  %v496_v22 = vld [vmem:[#allocation5 + $0xc90] sm:$0xff]  ;;  %v459_v23 = vld [vmem:[#allocation5 + $0xb68] sm:$0xff] }
  0x5b   :  { %697 = vmatpush1.msra.mxu0 %v166_v55  ;;  %768 = vmatpush1.msra.mxu1 %v168_v56  ;;  %v461_v24 = vld [vmem:[#allocation5 + $0xb78] sm:$0xff]  ;;  %v458_v25 = vld [vmem:[#allocation5 + $0xb60] sm:$0xff]  ;;  %v460_v26 = vld [vmem:[#allocation5 + $0xb70] sm:$0xff] }
  0x5c   :  { %698 = vmatprep.subr.mxu0 %v131_v57  ;;  %769 = vmatprep.subr.mxu1 %v133_v58  ;;  %v423_v27 = vld [vmem:[#allocation5 + $0xa48] sm:$0xff]  ;;  %v425_v28 = vld [vmem:[#allocation5 + $0xa58] sm:$0xff]  ;;  %v422_v29 = vld [vmem:[#allocation5 + $0xa40] sm:$0xff] }
  0x5d   :  { %699 = vmatpush1.msra.mxu0 %v130_v59  ;;  %770 = vmatpush1.msra.mxu1 %v132_v60  ;;  %v424_v30 = vld [vmem:[#allocation5 + $0xa50] sm:$0xff]  ;;  %v387_v31 = vld [vmem:[#allocation5 + $0x928] sm:$0xff]  ;;  %v389_v32 = vld [vmem:[#allocation5 + $0x938] sm:$0xff] }
  0x5e   :  { %700 = vmatprep.subr.mxu0 %v95_v61  ;;  %771 = vmatprep.subr.mxu1 %v97_v62  ;;  %v386_v33 = vld [vmem:[#allocation5 + $0x920] sm:$0xff]  ;;  %v388_v34 = vld [vmem:[#allocation5 + $0x930] sm:$0xff]  ;;  %v351_v35 = vld [vmem:[#allocation5 + $0x808] sm:$0xff] }
  0x5f   :  { %701 = vmatpush1.msra.mxu0 %v94_v63  ;;  %772 = vmatpush1.msra.mxu1 %v96_v1  ;;  %v353_v36 = vld [vmem:[#allocation5 + $0x818] sm:$0xff]  ;;  %v350_v37 = vld [vmem:[#allocation5 + $0x800] sm:$0xff]  ;;  %v352_v38 = vld [vmem:[#allocation5 + $0x810] sm:$0xff] }
  0x60   :  { %735 = vmatmul.mubr.f32.vlgmr.msra.gmra.mxu0 %v4296_v2  ;;  %812 = vmatprep.subr.mxu0 %v639_v3  ;;  %v315_v39 = vld [vmem:[#allocation5 + $0x6e8] sm:$0xff]  ;;  %v317_v40 = vld [vmem:[#allocation5 + $0x6f8] sm:$0xff]  ;;  %v314_v41 = vld [vmem:[#allocation5 + $0x6e0] sm:$0xff] }
  0x61   :  { %883 = vmatprep.subr.mxu1 %v641_v4  ;;  %806 = vmatmul.mubr.f32.vlgmr.msra.gmra.mxu1 %v4296_v2  ;;  %v316_v42 = vld [vmem:[#allocation5 + $0x6f0] sm:$0xff]  ;;  %v279_v43 = vld [vmem:[#allocation5 + $0x5c8] sm:$0xff]  ;;  %v281_v44 = vld [vmem:[#allocation5 + $0x5d8] sm:$0xff] }
  0x62   :  { %813 = vmatpush1.msra.mxu0 %v638_v5  ;;  %884 = vmatpush1.msra.mxu1 %v640_v6  ;;  %v278_v45 = vld [vmem:[#allocation5 + $0x5c0] sm:$0xff]  ;;  %v280_v46 = vld [vmem:[#allocation5 + $0x5d0] sm:$0xff]  ;;  %v243_v47 = vld [vmem:[#allocation5 + $0x4a8] sm:$0xff] }
  0x63   :  { %814 = vmatprep.subr.mxu0 %v603_v7  ;;  %885 = vmatprep.subr.mxu1 %v605_v8  ;;  %v245_v48 = vld [vmem:[#allocation5 + $0x4b8] sm:$0xff]  ;;  %v242_v49 = vld [vmem:[#allocation5 + $0x4a0] sm:$0xff]  ;;  %v244_v50 = vld [vmem:[#allocation5 + $0x4b0] sm:$0xff] }
  0x64   :  { %815 = vmatpush1.msra.mxu0 %v602_v9  ;;  %886 = vmatpush1.msra.mxu1 %v604_v10  ;;  %v207_v51 = vld [vmem:[#allocation5 + $0x388] sm:$0xff]  ;;  %v209_v52 = vld [vmem:[#allocation5 + $0x398] sm:$0xff]  ;;  %v206_v53 = vld [vmem:[#allocation5 + $0x380] sm:$0xff] }
  0x65   :  { %816 = vmatprep.subr.mxu0 %v567_v11  ;;  %887 = vmatprep.subr.mxu1 %v569_v12  ;;  %v208_v54 = vld [vmem:[#allocation5 + $0x390] sm:$0xff]  ;;  %v171_v55 = vld [vmem:[#allocation5 + $0x268] sm:$0xff]  ;;  %v173_v56 = vld [vmem:[#allocation5 + $0x278] sm:$0xff] }
  0x66   :  { %817 = vmatpush1.msra.mxu0 %v566_v13  ;;  %888 = vmatpush1.msra.mxu1 %v568_v14  ;;  %v170_v57 = vld [vmem:[#allocation5 + $0x260] sm:$0xff]  ;;  %v172_v58 = vld [vmem:[#allocation5 + $0x270] sm:$0xff]  ;;  %v135_v59 = vld [vmem:[#allocation5 + $0x148] sm:$0xff] }
  0x67   :  { %818 = vmatprep.subr.mxu0 %v531_v15  ;;  %889 = vmatprep.subr.mxu1 %v533_v16  ;;  %v137_v60 = vld [vmem:[#allocation5 + $0x158] sm:$0xff]  ;;  %v134_v61 = vld [vmem:[#allocation5 + $0x140] sm:$0xff]  ;;  %v136_v62 = vld [vmem:[#allocation5 + $0x150] sm:$0xff] }
  0x68   :  { %819 = vmatpush1.msra.mxu0 %v530_v17  ;;  %890 = vmatpush1.msra.mxu1 %v532_v18  ;;  %v99_v63 = vld [vmem:[#allocation5 + $0x28] sm:$0xff]  ;;  %v101_v1 = vld [vmem:[#allocation5 + $0x38] sm:$0xff]  ;;  %v98_v3 = vld [vmem:[#allocation5 + $0x20] sm:$0xff] }
  0x69   :  { %820 = vmatprep.subr.mxu0 %v495_v19  ;;  %891 = vmatprep.subr.mxu1 %v497_v20  ;;  %v100_v4 = vld [vmem:[#allocation5 + $0x30] sm:$0xff]  ;;  %v643_v5 = vld [vmem:[#allocation5 + $0x1128] sm:$0xff]  ;;  %v645_v6 = vld [vmem:[#allocation5 + $0x1138] sm:$0xff] }
  0x6a   :  { %821 = vmatpush1.msra.mxu0 %v494_v21  ;;  %892 = vmatpush1.msra.mxu1 %v496_v22  ;;  %v642_v7 = vld [vmem:[#allocation5 + $0x1120] sm:$0xff]  ;;  %v644_v8 = vld [vmem:[#allocation5 + $0x1130] sm:$0xff]  ;;  %v607_v9 = vld [vmem:[#allocation5 + $0x1008] sm:$0xff] }
  0x6b   :  { %822 = vmatprep.subr.mxu0 %v459_v23  ;;  %893 = vmatprep.subr.mxu1 %v461_v24  ;;  %v609_v10 = vld [vmem:[#allocation5 + $0x1018] sm:$0xff]  ;;  %v606_v11 = vld [vmem:[#allocation5 + $0x1000] sm:$0xff]  ;;  %v608_v12 = vld [vmem:[#allocation5 + $0x1010] sm:$0xff] }
  0x6c   :  { %823 = vmatpush1.msra.mxu0 %v458_v25  ;;  %894 = vmatpush1.msra.mxu1 %v460_v26  ;;  %v571_v13 = vld [vmem:[#allocation5 + $0xee8] sm:$0xff]  ;;  %v573_v14 = vld [vmem:[#allocation5 + $0xef8] sm:$0xff]  ;;  %v570_v15 = vld [vmem:[#allocation5 + $0xee0] sm:$0xff] }
  0x6d   :  { %824 = vmatprep.subr.mxu0 %v423_v27  ;;  %895 = vmatprep.subr.mxu1 %v425_v28  ;;  %v572_v16 = vld [vmem:[#allocation5 + $0xef0] sm:$0xff]  ;;  %v535_v17 = vld [vmem:[#allocation5 + $0xdc8] sm:$0xff]  ;;  %v537_v18 = vld [vmem:[#allocation5 + $0xdd8] sm:$0xff] }
  0x6e   :  { %825 = vmatpush1.msra.mxu0 %v422_v29  ;;  %896 = vmatpush1.msra.mxu1 %v424_v30  ;;  %v534_v19 = vld [vmem:[#allocation5 + $0xdc0] sm:$0xff]  ;;  %v536_v20 = vld [vmem:[#allocation5 + $0xdd0] sm:$0xff]  ;;  %v499_v21 = vld [vmem:[#allocation5 + $0xca8] sm:$0xff] }
  0x6f   :  { %826 = vmatprep.subr.mxu0 %v387_v31  ;;  %897 = vmatprep.subr.mxu1 %v389_v32  ;;  %v501_v22 = vld [vmem:[#allocation5 + $0xcb8] sm:$0xff]  ;;  %v498_v23 = vld [vmem:[#allocation5 + $0xca0] sm:$0xff]  ;;  %v500_v24 = vld [vmem:[#allocation5 + $0xcb0] sm:$0xff] }
  0x70   :  { %827 = vmatpush1.msra.mxu0 %v386_v33  ;;  %898 = vmatpush1.msra.mxu1 %v388_v34  ;;  %v463_v25 = vld [vmem:[#allocation5 + $0xb88] sm:$0xff]  ;;  %v465_v26 = vld [vmem:[#allocation5 + $0xb98] sm:$0xff]  ;;  %v462_v27 = vld [vmem:[#allocation5 + $0xb80] sm:$0xff] }
  0x71   :  { %828 = vmatprep.subr.mxu0 %v351_v35  ;;  %899 = vmatprep.subr.mxu1 %v353_v36  ;;  %v464_v28 = vld [vmem:[#allocation5 + $0xb90] sm:$0xff]  ;;  %v427_v29 = vld [vmem:[#allocation5 + $0xa68] sm:$0xff]  ;;  %v429_v30 = vld [vmem:[#allocation5 + $0xa78] sm:$0xff] }
  0x72   :  { %829 = vmatpush1.msra.mxu0 %v350_v37  ;;  %900 = vmatpush1.msra.mxu1 %v352_v38  ;;  %v426_v31 = vld [vmem:[#allocation5 + $0xa60] sm:$0xff]  ;;  %v428_v32 = vld [vmem:[#allocation5 + $0xa70] sm:$0xff]  ;;  %v391_v33 = vld [vmem:[#allocation5 + $0x948] sm:$0xff] }
  0x73   :  { %830 = vmatprep.subr.mxu0 %v315_v39  ;;  %901 = vmatprep.subr.mxu1 %v317_v40  ;;  %v393_v34 = vld [vmem:[#allocation5 + $0x958] sm:$0xff]  ;;  %v390_v35 = vld [vmem:[#allocation5 + $0x940] sm:$0xff]  ;;  %v392_v36 = vld [vmem:[#allocation5 + $0x950] sm:$0xff] }
  0x74   :  { %831 = vmatpush1.msra.mxu0 %v314_v41  ;;  %902 = vmatpush1.msra.mxu1 %v316_v42  ;;  %v355_v37 = vld [vmem:[#allocation5 + $0x828] sm:$0xff]  ;;  %v357_v38 = vld [vmem:[#allocation5 + $0x838] sm:$0xff]  ;;  %v354_v39 = vld [vmem:[#allocation5 + $0x820] sm:$0xff] }
  0x75   :  { %832 = vmatprep.subr.mxu0 %v279_v43  ;;  %903 = vmatprep.subr.mxu1 %v281_v44  ;;  %v356_v40 = vld [vmem:[#allocation5 + $0x830] sm:$0xff]  ;;  %v319_v41 = vld [vmem:[#allocation5 + $0x708] sm:$0xff]  ;;  %v321_v42 = vld [vmem:[#allocation5 + $0x718] sm:$0xff] }
  0x76   :  { %833 = vmatpush1.msra.mxu0 %v278_v45  ;;  %904 = vmatpush1.msra.mxu1 %v280_v46  ;;  %v318_v43 = vld [vmem:[#allocation5 + $0x700] sm:$0xff]  ;;  %v320_v44 = vld [vmem:[#allocation5 + $0x710] sm:$0xff]  ;;  %v283_v45 = vld [vmem:[#allocation5 + $0x5e8] sm:$0xff] }
  0x77   :  { %834 = vmatprep.subr.mxu0 %v243_v47  ;;  %905 = vmatprep.subr.mxu1 %v245_v48  ;;  %v285_v46 = vld [vmem:[#allocation5 + $0x5f8] sm:$0xff]  ;;  %v282_v47 = vld [vmem:[#allocation5 + $0x5e0] sm:$0xff]  ;;  %v284_v48 = vld [vmem:[#allocation5 + $0x5f0] sm:$0xff] }
  0x78   :  { %835 = vmatpush1.msra.mxu0 %v242_v49  ;;  %906 = vmatpush1.msra.mxu1 %v244_v50  ;;  %v247_v49 = vld [vmem:[#allocation5 + $0x4c8] sm:$0xff]  ;;  %v249_v50 = vld [vmem:[#allocation5 + $0x4d8] sm:$0xff] }
  0x79   :  { %836 = vmatprep.subr.mxu0 %v207_v51  ;;  %907 = vmatprep.subr.mxu1 %v209_v52  ;;  %v246_v51 = vld [vmem:[#allocation5 + $0x4c0] sm:$0xff]  ;;  %v248_v52 = vld [vmem:[#allocation5 + $0x4d0] sm:$0xff] }
  0x7a   :  { %837 = vmatpush1.msra.mxu0 %v206_v53  ;;  %908 = vmatpush1.msra.mxu1 %v208_v54  ;;  %v211_v53 = vld [vmem:[#allocation5 + $0x3a8] sm:$0xff]  ;;  %v213_v54 = vld [vmem:[#allocation5 + $0x3b8] sm:$0xff] }
  0x7b   :  { %838 = vmatprep.subr.mxu0 %v171_v55  ;;  %909 = vmatprep.subr.mxu1 %v173_v56  ;;  %v210_v55 = vld [vmem:[#allocation5 + $0x3a0] sm:$0xff]  ;;  %v212_v56 = vld [vmem:[#allocation5 + $0x3b0] sm:$0xff] }
  0x7c   :  { %839 = vmatpush1.msra.mxu0 %v170_v57  ;;  %910 = vmatpush1.msra.mxu1 %v172_v58  ;;  %v175_v57 = vld [vmem:[#allocation5 + $0x288] sm:$0xff]  ;;  %v177_v58 = vld [vmem:[#allocation5 + $0x298] sm:$0xff] }
  0x7d   :  { %840 = vmatprep.subr.mxu0 %v135_v59  ;;  %911 = vmatprep.subr.mxu1 %v137_v60  ;;  %v174_v59 = vld [vmem:[#allocation5 + $0x280] sm:$0xff]  ;;  %v176_v60 = vld [vmem:[#allocation5 + $0x290] sm:$0xff] }
  0x7e   :  { %841 = vmatpush1.msra.mxu0 %v134_v61  ;;  %912 = vmatpush1.msra.mxu1 %v136_v62  ;;  %v139_v61 = vld [vmem:[#allocation5 + $0x168] sm:$0xff]  ;;  %v141_v62 = vld [vmem:[#allocation5 + $0x178] sm:$0xff] }
  0x7f   :  { %842 = vmatprep.subr.mxu0 %v99_v63  ;;  %913 = vmatprep.subr.mxu1 %v101_v1  ;;  %v138_v63 = vld [vmem:[#allocation5 + $0x160] sm:$0xff]  ;;  %v140_v1 = vld [vmem:[#allocation5 + $0x170] sm:$0xff] }
  0x80   :  { %843 = vmatpush1.msra.mxu0 %v98_v3  ;;  %876 = vmatprep.mubr.f32.mxu0 %v4222_v0  ;;  %v103_v3 = vld [vmem:[#allocation5 + $0x48] sm:$0xff] }
  0x81   :  { %914 = vmatpush1.msra.mxu1 %v100_v4  ;;  %877 = vmatmul.mubr.f32.vlgmr.msra.gmra.mxu0 %v4296_v2  ;;  %v105_v4 = vld [vmem:[#allocation5 + $0x58] sm:$0xff] }
  0x82   :  { %947 = vmatprep.mubr.f32.mxu1 %v4222_v0  ;;  %954 = vmatprep.subr.mxu0 %v643_v5  ;;  %v102_v5 = vld [vmem:[#allocation5 + $0x40] sm:$0xff] }
  0x83   :  { %1025 = vmatprep.subr.mxu1 %v645_v6  ;;  %948 = vmatmul.mubr.f32.vlgmr.msra.gmra.mxu1 %v4296_v2  ;;  %v104_v6 = vld [vmem:[#allocation5 + $0x50] sm:$0xff] }
  0x84   :  { %955 = vmatpush1.msra.mxu0 %v642_v7  ;;  %1026 = vmatpush1.msra.mxu1 %v644_v8  ;;  %v647_v7 = vld [vmem:[#allocation5 + $0x1148] sm:$0xff]  ;;  %v649_v8 = vld [vmem:[#allocation5 + $0x1158] sm:$0xff] }
  0x85   :  { %956 = vmatprep.subr.mxu0 %v607_v9  ;;  %1027 = vmatprep.subr.mxu1 %v609_v10  ;;  %v646_v9 = vld [vmem:[#allocation5 + $0x1140] sm:$0xff]  ;;  %v648_v10 = vld [vmem:[#allocation5 + $0x1150] sm:$0xff] }
  0x86   :  { %957 = vmatpush1.msra.mxu0 %v606_v11  ;;  %1028 = vmatpush1.msra.mxu1 %v608_v12  ;;  %v611_v11 = vld [vmem:[#allocation5 + $0x1028] sm:$0xff]  ;;  %v613_v12 = vld [vmem:[#allocation5 + $0x1038] sm:$0xff] }
  0x87   :  { %958 = vmatprep.subr.mxu0 %v571_v13  ;;  %1029 = vmatprep.subr.mxu1 %v573_v14  ;;  %v610_v13 = vld [vmem:[#allocation5 + $0x1020] sm:$0xff]  ;;  %v612_v14 = vld [vmem:[#allocation5 + $0x1030] sm:$0xff] }
  0x88   :  { %959 = vmatpush1.msra.mxu0 %v570_v15  ;;  %1030 = vmatpush1.msra.mxu1 %v572_v16  ;;  %v575_v15 = vld [vmem:[#allocation5 + $0xf08] sm:$0xff]  ;;  %v577_v16 = vld [vmem:[#allocation5 + $0xf18] sm:$0xff] }
  0x89   :  { %960 = vmatprep.subr.mxu0 %v535_v17  ;;  %1031 = vmatprep.subr.mxu1 %v537_v18  ;;  %v574_v17 = vld [vmem:[#allocation5 + $0xf00] sm:$0xff]  ;;  %v576_v18 = vld [vmem:[#allocation5 + $0xf10] sm:$0xff] }
  0x8a   :  { %961 = vmatpush1.msra.mxu0 %v534_v19  ;;  %1032 = vmatpush1.msra.mxu1 %v536_v20  ;;  %v539_v19 = vld [vmem:[#allocation5 + $0xde8] sm:$0xff]  ;;  %v541_v20 = vld [vmem:[#allocation5 + $0xdf8] sm:$0xff] }
  0x8b   :  { %962 = vmatprep.subr.mxu0 %v499_v21  ;;  %1033 = vmatprep.subr.mxu1 %v501_v22  ;;  %v538_v21 = vld [vmem:[#allocation5 + $0xde0] sm:$0xff]  ;;  %v540_v22 = vld [vmem:[#allocation5 + $0xdf0] sm:$0xff] }
  0x8c   :  { %963 = vmatpush1.msra.mxu0 %v498_v23  ;;  %1034 = vmatpush1.msra.mxu1 %v500_v24  ;;  %v503_v23 = vld [vmem:[#allocation5 + $0xcc8] sm:$0xff]  ;;  %v505_v24 = vld [vmem:[#allocation5 + $0xcd8] sm:$0xff] }
  0x8d   :  { %964 = vmatprep.subr.mxu0 %v463_v25  ;;  %1035 = vmatprep.subr.mxu1 %v465_v26  ;;  %v502_v25 = vld [vmem:[#allocation5 + $0xcc0] sm:$0xff]  ;;  %v504_v26 = vld [vmem:[#allocation5 + $0xcd0] sm:$0xff] }
  0x8e   :  { %965 = vmatpush1.msra.mxu0 %v462_v27  ;;  %1036 = vmatpush1.msra.mxu1 %v464_v28  ;;  %v467_v27 = vld [vmem:[#allocation5 + $0xba8] sm:$0xff]  ;;  %v469_v28 = vld [vmem:[#allocation5 + $0xbb8] sm:$0xff] }
  0x8f   :  { %966 = vmatprep.subr.mxu0 %v427_v29  ;;  %1037 = vmatprep.subr.mxu1 %v429_v30  ;;  %v466_v29 = vld [vmem:[#allocation5 + $0xba0] sm:$0xff]  ;;  %v468_v30 = vld [vmem:[#allocation5 + $0xbb0] sm:$0xff] }
  0x90   :  { %967 = vmatpush1.msra.mxu0 %v426_v31  ;;  %1038 = vmatpush1.msra.mxu1 %v428_v32  ;;  %v431_v31 = vld [vmem:[#allocation5 + $0xa88] sm:$0xff]  ;;  %v433_v32 = vld [vmem:[#allocation5 + $0xa98] sm:$0xff] }
  0x91   :  { %968 = vmatprep.subr.mxu0 %v391_v33  ;;  %1039 = vmatprep.subr.mxu1 %v393_v34  ;;  %v430_v33 = vld [vmem:[#allocation5 + $0xa80] sm:$0xff]  ;;  %v432_v34 = vld [vmem:[#allocation5 + $0xa90] sm:$0xff] }
  0x92   :  { %969 = vmatpush1.msra.mxu0 %v390_v35  ;;  %1040 = vmatpush1.msra.mxu1 %v392_v36  ;;  %v395_v35 = vld [vmem:[#allocation5 + $0x968] sm:$0xff]  ;;  %v397_v36 = vld [vmem:[#allocation5 + $0x978] sm:$0xff] }
  0x93   :  { %970 = vmatprep.subr.mxu0 %v355_v37  ;;  %1041 = vmatprep.subr.mxu1 %v357_v38  ;;  %v394_v37 = vld [vmem:[#allocation5 + $0x960] sm:$0xff]  ;;  %v396_v38 = vld [vmem:[#allocation5 + $0x970] sm:$0xff] }
  0x94   :  { %971 = vmatpush1.msra.mxu0 %v354_v39  ;;  %1042 = vmatpush1.msra.mxu1 %v356_v40  ;;  %v359_v39 = vld [vmem:[#allocation5 + $0x848] sm:$0xff]  ;;  %v361_v40 = vld [vmem:[#allocation5 + $0x858] sm:$0xff] }
  0x95   :  { %972 = vmatprep.subr.mxu0 %v319_v41  ;;  %1043 = vmatprep.subr.mxu1 %v321_v42  ;;  %v358_v41 = vld [vmem:[#allocation5 + $0x840] sm:$0xff]  ;;  %v360_v42 = vld [vmem:[#allocation5 + $0x850] sm:$0xff] }
  0x96   :  { %973 = vmatpush1.msra.mxu0 %v318_v43  ;;  %1044 = vmatpush1.msra.mxu1 %v320_v44  ;;  %v323_v43 = vld [vmem:[#allocation5 + $0x728] sm:$0xff]  ;;  %v325_v44 = vld [vmem:[#allocation5 + $0x738] sm:$0xff] }
  0x97   :  { %974 = vmatprep.subr.mxu0 %v283_v45  ;;  %1045 = vmatprep.subr.mxu1 %v285_v46  ;;  %v322_v45 = vld [vmem:[#allocation5 + $0x720] sm:$0xff]  ;;  %v324_v46 = vld [vmem:[#allocation5 + $0x730] sm:$0xff] }
  0x98   :  { %975 = vmatpush1.msra.mxu0 %v282_v47  ;;  %1046 = vmatpush1.msra.mxu1 %v284_v48  ;;  %v287_v47 = vld [vmem:[#allocation5 + $0x608] sm:$0xff]  ;;  %v289_v48 = vld [vmem:[#allocation5 + $0x618] sm:$0xff] }
  0x99   :  { %976 = vmatprep.subr.mxu0 %v247_v49  ;;  %1047 = vmatprep.subr.mxu1 %v249_v50  ;;  %v286_v49 = vld [vmem:[#allocation5 + $0x600] sm:$0xff]  ;;  %v288_v50 = vld [vmem:[#allocation5 + $0x610] sm:$0xff] }
  0x9a   :  { %977 = vmatpush1.msra.mxu0 %v246_v51  ;;  %1048 = vmatpush1.msra.mxu1 %v248_v52  ;;  %v251_v51 = vld [vmem:[#allocation5 + $0x4e8] sm:$0xff]  ;;  %v253_v52 = vld [vmem:[#allocation5 + $0x4f8] sm:$0xff] }
  0x9b   :  { %978 = vmatprep.subr.mxu0 %v211_v53  ;;  %1049 = vmatprep.subr.mxu1 %v213_v54  ;;  %v250_v53 = vld [vmem:[#allocation5 + $0x4e0] sm:$0xff]  ;;  %v252_v54 = vld [vmem:[#allocation5 + $0x4f0] sm:$0xff] }
  0x9c   :  { %979 = vmatpush1.msra.mxu0 %v210_v55  ;;  %1050 = vmatpush1.msra.mxu1 %v212_v56  ;;  %v215_v55 = vld [vmem:[#allocation5 + $0x3c8] sm:$0xff]  ;;  %v217_v56 = vld [vmem:[#allocation5 + $0x3d8] sm:$0xff] }
  0x9d   :  { %980 = vmatprep.subr.mxu0 %v175_v57  ;;  %1051 = vmatprep.subr.mxu1 %v177_v58  ;;  %v214_v57 = vld [vmem:[#allocation5 + $0x3c0] sm:$0xff]  ;;  %v216_v58 = vld [vmem:[#allocation5 + $0x3d0] sm:$0xff] }
  0x9e   :  { %981 = vmatpush1.msra.mxu0 %v174_v59  ;;  %1052 = vmatpush1.msra.mxu1 %v176_v60  ;;  %v179_v59 = vld [vmem:[#allocation5 + $0x2a8] sm:$0xff]  ;;  %v181_v60 = vld [vmem:[#allocation5 + $0x2b8] sm:$0xff] }
  0x9f   :  { %982 = vmatprep.subr.mxu0 %v139_v61  ;;  %1053 = vmatprep.subr.mxu1 %v141_v62  ;;  %v178_v61 = vld [vmem:[#allocation5 + $0x2a0] sm:$0xff]  ;;  %v180_v62 = vld [vmem:[#allocation5 + $0x2b0] sm:$0xff] }
  0xa0   :  { %983 = vmatpush1.msra.mxu0 %v138_v63  ;;  %1054 = vmatpush1.msra.mxu1 %v140_v1  ;;  %v143_v63 = vld [vmem:[#allocation5 + $0x188] sm:$0xff]  ;;  %v145_v1 = vld [vmem:[#allocation5 + $0x198] sm:$0xff] }
  0xa1   :  { %984 = vmatprep.subr.mxu0 %v103_v3  ;;  %1055 = vmatprep.subr.mxu1 %v105_v4  ;;  %v142_v3 = vld [vmem:[#allocation5 + $0x180] sm:$0xff]  ;;  %v144_v4 = vld [vmem:[#allocation5 + $0x190] sm:$0xff] }
  0xa2   :  { %985 = vmatpush1.msra.mxu0 %v102_v5  ;;  %1018 = vmatprep.mubr.f32.mxu0 %v4222_v0  ;;  %v107_v5 = vld [vmem:[#allocation5 + $0x68] sm:$0xff] }
  0xa3   :  { %1056 = vmatpush1.msra.mxu1 %v104_v6  ;;  %1019 = vmatmul.mubr.f32.vlgmr.msra.gmra.mxu0 %v4296_v2  ;;  %v109_v6 = vld [vmem:[#allocation5 + $0x78] sm:$0xff] }
  0xa4   :  { %1089 = vmatprep.mubr.f32.mxu1 %v4222_v0  ;;  %1096 = vmatprep.subr.mxu0 %v647_v7  ;;  %v106_v7 = vld [vmem:[#allocation5 + $0x60] sm:$0xff] }
  0xa5   :  { %1167 = vmatprep.subr.mxu1 %v649_v8  ;;  %1090 = vmatmul.mubr.f32.vlgmr.msra.gmra.mxu1 %v4296_v2  ;;  %v108_v8 = vld [vmem:[#allocation5 + $0x70] sm:$0xff] }
  0xa6   :  { %1097 = vmatpush1.msra.mxu0 %v646_v9  ;;  %1168 = vmatpush1.msra.mxu1 %v648_v10  ;;  %v651_v9 = vld [vmem:[#allocation5 + $0x1168] sm:$0xff]  ;;  %v653_v10 = vld [vmem:[#allocation5 + $0x1178] sm:$0xff] }
  0xa7   :  { %1098 = vmatprep.subr.mxu0 %v611_v11  ;;  %1169 = vmatprep.subr.mxu1 %v613_v12  ;;  %v650_v11 = vld [vmem:[#allocation5 + $0x1160] sm:$0xff]  ;;  %v652_v12 = vld [vmem:[#allocation5 + $0x1170] sm:$0xff] }
  0xa8   :  { %1099 = vmatpush1.msra.mxu0 %v610_v13  ;;  %1170 = vmatpush1.msra.mxu1 %v612_v14  ;;  %v615_v13 = vld [vmem:[#allocation5 + $0x1048] sm:$0xff]  ;;  %v617_v14 = vld [vmem:[#allocation5 + $0x1058] sm:$0xff] }
  0xa9   :  { %1100 = vmatprep.subr.mxu0 %v575_v15  ;;  %1171 = vmatprep.subr.mxu1 %v577_v16  ;;  %v614_v15 = vld [vmem:[#allocation5 + $0x1040] sm:$0xff]  ;;  %v616_v16 = vld [vmem:[#allocation5 + $0x1050] sm:$0xff] }
  0xaa   :  { %1101 = vmatpush1.msra.mxu0 %v574_v17  ;;  %1172 = vmatpush1.msra.mxu1 %v576_v18  ;;  %v579_v17 = vld [vmem:[#allocation5 + $0xf28] sm:$0xff]  ;;  %v581_v18 = vld [vmem:[#allocation5 + $0xf38] sm:$0xff] }
  0xab   :  { %1102 = vmatprep.subr.mxu0 %v539_v19  ;;  %1173 = vmatprep.subr.mxu1 %v541_v20  ;;  %v578_v19 = vld [vmem:[#allocation5 + $0xf20] sm:$0xff]  ;;  %v580_v20 = vld [vmem:[#allocation5 + $0xf30] sm:$0xff] }
  0xac   :  { %1103 = vmatpush1.msra.mxu0 %v538_v21  ;;  %1174 = vmatpush1.msra.mxu1 %v540_v22  ;;  %v543_v21 = vld [vmem:[#allocation5 + $0xe08] sm:$0xff]  ;;  %v545_v22 = vld [vmem:[#allocation5 + $0xe18] sm:$0xff] }
  0xad   :  { %1104 = vmatprep.subr.mxu0 %v503_v23  ;;  %1175 = vmatprep.subr.mxu1 %v505_v24  ;;  %v542_v23 = vld [vmem:[#allocation5 + $0xe00] sm:$0xff]  ;;  %v544_v24 = vld [vmem:[#allocation5 + $0xe10] sm:$0xff] }
  0xae   :  { %1105 = vmatpush1.msra.mxu0 %v502_v25  ;;  %1176 = vmatpush1.msra.mxu1 %v504_v26  ;;  %v509_v25 = vld [vmem:[#allocation5 + $0xcf8] sm:$0xff]  ;;  %v506_v26 = vld [vmem:[#allocation5 + $0xce0] sm:$0xff] }
  0xaf   :  { %1106 = vmatprep.subr.mxu0 %v467_v27  ;;  %1177 = vmatprep.subr.mxu1 %v469_v28  ;;  %v508_v27 = vld [vmem:[#allocation5 + $0xcf0] sm:$0xff]  ;;  %v471_v28 = vld [vmem:[#allocation5 + $0xbc8] sm:$0xff] }
  0xb0   :  { %1107 = vmatpush1.msra.mxu0 %v466_v29  ;;  %1178 = vmatpush1.msra.mxu1 %v468_v30  ;;  %v473_v29 = vld [vmem:[#allocation5 + $0xbd8] sm:$0xff]  ;;  %v470_v30 = vld [vmem:[#allocation5 + $0xbc0] sm:$0xff] }
  0xb1   :  { %1108 = vmatprep.subr.mxu0 %v431_v31  ;;  %1179 = vmatprep.subr.mxu1 %v433_v32  ;;  %v472_v31 = vld [vmem:[#allocation5 + $0xbd0] sm:$0xff]  ;;  %v435_v32 = vld [vmem:[#allocation5 + $0xaa8] sm:$0xff] }
  0xb2   :  { %1109 = vmatpush1.msra.mxu0 %v430_v33  ;;  %1180 = vmatpush1.msra.mxu1 %v432_v34  ;;  %v437_v33 = vld [vmem:[#allocation5 + $0xab8] sm:$0xff]  ;;  %v434_v34 = vld [vmem:[#allocation5 + $0xaa0] sm:$0xff] }
  0xb3   :  { %1110 = vmatprep.subr.mxu0 %v395_v35  ;;  %1181 = vmatprep.subr.mxu1 %v397_v36  ;;  %v436_v35 = vld [vmem:[#allocation5 + $0xab0] sm:$0xff]  ;;  %v399_v36 = vld [vmem:[#allocation5 + $0x988] sm:$0xff] }
  0xb4   :  { %1111 = vmatpush1.msra.mxu0 %v394_v37  ;;  %1182 = vmatpush1.msra.mxu1 %v396_v38  ;;  %v401_v37 = vld [vmem:[#allocation5 + $0x998] sm:$0xff]  ;;  %v398_v38 = vld [vmem:[#allocation5 + $0x980] sm:$0xff] }
  0xb5   :  { %1112 = vmatprep.subr.mxu0 %v359_v39  ;;  %1183 = vmatprep.subr.mxu1 %v361_v40  ;;  %v400_v39 = vld [vmem:[#allocation5 + $0x990] sm:$0xff]  ;;  %v363_v40 = vld [vmem:[#allocation5 + $0x868] sm:$0xff] }
  0xb6   :  { %1113 = vmatpush1.msra.mxu0 %v358_v41  ;;  %1184 = vmatpush1.msra.mxu1 %v360_v42  ;;  %v365_v41 = vld [vmem:[#allocation5 + $0x878] sm:$0xff]  ;;  %v362_v42 = vld [vmem:[#allocation5 + $0x860] sm:$0xff] }
  0xb7   :  { %1114 = vmatprep.subr.mxu0 %v323_v43  ;;  %1185 = vmatprep.subr.mxu1 %v325_v44  ;;  %v364_v43 = vld [vmem:[#allocation5 + $0x870] sm:$0xff]  ;;  %v327_v44 = vld [vmem:[#allocation5 + $0x748] sm:$0xff] }
  0xb8   :  { %1115 = vmatpush1.msra.mxu0 %v322_v45  ;;  %1186 = vmatpush1.msra.mxu1 %v324_v46  ;;  %v329_v45 = vld [vmem:[#allocation5 + $0x758] sm:$0xff]  ;;  %v326_v46 = vld [vmem:[#allocation5 + $0x740] sm:$0xff] }
  0xb9   :  { %1116 = vmatprep.subr.mxu0 %v287_v47  ;;  %1187 = vmatprep.subr.mxu1 %v289_v48  ;;  %v328_v47 = vld [vmem:[#allocation5 + $0x750] sm:$0xff]  ;;  %v291_v48 = vld [vmem:[#allocation5 + $0x628] sm:$0xff] }
  0xba   :  { %1117 = vmatpush1.msra.mxu0 %v286_v49  ;;  %1188 = vmatpush1.msra.mxu1 %v288_v50  ;;  %v293_v49 = vld [vmem:[#allocation5 + $0x638] sm:$0xff]  ;;  %v290_v50 = vld [vmem:[#allocation5 + $0x620] sm:$0xff] }
  0xbb   :  { %1118 = vmatprep.subr.mxu0 %v251_v51  ;;  %1189 = vmatprep.subr.mxu1 %v253_v52  ;;  %v292_v51 = vld [vmem:[#allocation5 + $0x630] sm:$0xff]  ;;  %v255_v52 = vld [vmem:[#allocation5 + $0x508] sm:$0xff] }
  0xbc   :  { %1119 = vmatpush1.msra.mxu0 %v250_v53  ;;  %1190 = vmatpush1.msra.mxu1 %v252_v54  ;;  %v257_v53 = vld [vmem:[#allocation5 + $0x518] sm:$0xff]  ;;  %v254_v54 = vld [vmem:[#allocation5 + $0x500] sm:$0xff] }
  0xbd   :  { %1120 = vmatprep.subr.mxu0 %v215_v55  ;;  %1191 = vmatprep.subr.mxu1 %v217_v56  ;;  %v256_v55 = vld [vmem:[#allocation5 + $0x510] sm:$0xff]  ;;  %v219_v56 = vld [vmem:[#allocation5 + $0x3e8] sm:$0xff] }
  0xbe   :  { %1121 = vmatpush1.msra.mxu0 %v214_v57  ;;  %1192 = vmatpush1.msra.mxu1 %v216_v58  ;;  %v221_v57 = vld [vmem:[#allocation5 + $0x3f8] sm:$0xff]  ;;  %v218_v58 = vld [vmem:[#allocation5 + $0x3e0] sm:$0xff] }
  0xbf   :  { %1122 = vmatprep.subr.mxu0 %v179_v59  ;;  %1193 = vmatprep.subr.mxu1 %v181_v60  ;;  %v220_v59 = vld [vmem:[#allocation5 + $0x3f0] sm:$0xff]  ;;  %v183_v60 = vld [vmem:[#allocation5 + $0x2c8] sm:$0xff] }
  0xc0   :  { %1123 = vmatpush1.msra.mxu0 %v178_v61  ;;  %1194 = vmatpush1.msra.mxu1 %v180_v62  ;;  %v185_v61 = vld [vmem:[#allocation5 + $0x2d8] sm:$0xff]  ;;  %v182_v62 = vld [vmem:[#allocation5 + $0x2c0] sm:$0xff] }
  0xc1   :  { %1124 = vmatprep.subr.mxu0 %v143_v63  ;;  %1195 = vmatprep.subr.mxu1 %v145_v1  ;;  %v184_v63 = vld [vmem:[#allocation5 + $0x2d0] sm:$0xff]  ;;  %v147_v1 = vld [vmem:[#allocation5 + $0x1a8] sm:$0xff] }
  0xc2   :  { %1125 = vmatpush1.msra.mxu0 %v142_v3  ;;  %1196 = vmatpush1.msra.mxu1 %v144_v4  ;;  %v149_v3 = vld [vmem:[#allocation5 + $0x1b8] sm:$0xff]  ;;  %v146_v4 = vld [vmem:[#allocation5 + $0x1a0] sm:$0xff] }
  0xc3   :  { %1126 = vmatprep.subr.mxu0 %v107_v5  ;;  %1197 = vmatprep.subr.mxu1 %v109_v6  ;;  %v148_v5 = vld [vmem:[#allocation5 + $0x1b0] sm:$0xff]  ;;  %v111_v6 = vld [vmem:[#allocation5 + $0x88] sm:$0xff] }
  0xc4   :  { %1127 = vmatpush1.msra.mxu0 %v106_v7  ;;  %1160 = vmatprep.mubr.f32.mxu0 %v4222_v0  ;;  %v113_v7 = vld [vmem:[#allocation5 + $0x98] sm:$0xff] }
  0xc5   :  { %1198 = vmatpush1.msra.mxu1 %v108_v8  ;;  %1161 = vmatmul.mubr.f32.vlgmr.msra.gmra.mxu0 %v4296_v2  ;;  %v110_v8 = vld [vmem:[#allocation5 + $0x80] sm:$0xff] }
  0xc6   :  { %1231 = vmatprep.mubr.f32.mxu1 %v4222_v0  ;;  %1238 = vmatprep.subr.mxu0 %v651_v9  ;;  %v112_v9 = vld [vmem:[#allocation5 + $0x90] sm:$0xff] }
  0xc7   :  { %1309 = vmatprep.subr.mxu1 %v653_v10  ;;  %1232 = vmatmul.mubr.f32.vlgmr.msra.gmra.mxu1 %v4296_v2  ;;  %v507_v2 = vld [vmem:[#allocation5 + $0xce8] sm:$0xff] }
  0xc8   :  { %1239 = vmatpush1.msra.mxu0 %v650_v11  ;;  %1310 = vmatpush1.msra.mxu1 %v652_v12  ;;  %v655_v10 = vld [vmem:[#allocation5 + $0x1188] sm:$0xff]  ;;  %v657_v11 = vld [vmem:[#allocation5 + $0x1198] sm:$0xff] }
  0xc9   :  { %1240 = vmatprep.subr.mxu0 %v615_v13  ;;  %1311 = vmatprep.subr.mxu1 %v617_v14  ;;  %v4313_v12 = vld [vmem:[#allocation2] sm:$0xf]  ;;  %v654_v13 = vld [vmem:[#allocation5 + $0x1180] sm:$0xff]  ;;  %v656_v14 = vld [vmem:[#allocation5 + $0x1190] sm:$0xff] }
  0xca   :  { %1241 = vmatpush1.msra.mxu0 %v614_v15  ;;  %1312 = vmatpush1.msra.mxu1 %v616_v16  ;;  %v619_v15 = vld [vmem:[#allocation5 + $0x1068] sm:$0xff]  ;;  %v621_v16 = vld [vmem:[#allocation5 + $0x1078] sm:$0xff] }
  0xcb   :  { %1242 = vmatprep.subr.mxu0 %v579_v17  ;;  %1313 = vmatprep.subr.mxu1 %v581_v18  ;;  %v618_v17 = vld [vmem:[#allocation5 + $0x1060] sm:$0xff]  ;;  %v620_v18 = vld [vmem:[#allocation5 + $0x1070] sm:$0xff] }
  0xcc   :  { %1243 = vmatpush1.msra.mxu0 %v578_v19  ;;  %1314 = vmatpush1.msra.mxu1 %v580_v20  ;;  %v583_v19 = vld [vmem:[#allocation5 + $0xf48] sm:$0xff]  ;;  %v585_v20 = vld [vmem:[#allocation5 + $0xf58] sm:$0xff] }
  0xcd   :  { %1244 = vmatprep.subr.mxu0 %v543_v21  ;;  %1315 = vmatprep.subr.mxu1 %v545_v22  ;;  %v582_v21 = vld [vmem:[#allocation5 + $0xf40] sm:$0xff]  ;;  %v584_v22 = vld [vmem:[#allocation5 + $0xf50] sm:$0xff] }
  0xce   :  { %1245 = vmatpush1.msra.mxu0 %v542_v23  ;;  %1316 = vmatpush1.msra.mxu1 %v544_v24  ;;  %v547_v23 = vld [vmem:[#allocation5 + $0xe28] sm:$0xff]  ;;  %v549_v24 = vld [vmem:[#allocation5 + $0xe38] sm:$0xff] }
  0xcf   :  { %1246 = vmatprep.subr.mxu0 %v507_v2  ;;  %1317 = vmatprep.subr.mxu1 %v509_v25  ;;  %v546_v2 = vld [vmem:[#allocation5 + $0xe20] sm:$0xff]  ;;  %v548_v25 = vld [vmem:[#allocation5 + $0xe30] sm:$0xff] }
  0xd0   :  { %1247 = vmatpush1.msra.mxu0 %v506_v26  ;;  %1318 = vmatpush1.msra.mxu1 %v508_v27  ;;  %v511_v26 = vld [vmem:[#allocation5 + $0xd08] sm:$0xff]  ;;  %v513_v27 = vld [vmem:[#allocation5 + $0xd18] sm:$0xff] }
  0xd1   :  { %1248 = vmatprep.subr.mxu0 %v471_v28  ;;  %1319 = vmatprep.subr.mxu1 %v473_v29  ;;  %v510_v28 = vld [vmem:[#allocation5 + $0xd00] sm:$0xff]  ;;  %v512_v29 = vld [vmem:[#allocation5 + $0xd10] sm:$0xff] }
  0xd2   :  { %1249 = vmatpush1.msra.mxu0 %v470_v30  ;;  %1320 = vmatpush1.msra.mxu1 %v472_v31  ;;  %v475_v30 = vld [vmem:[#allocation5 + $0xbe8] sm:$0xff]  ;;  %v477_v31 = vld [vmem:[#allocation5 + $0xbf8] sm:$0xff] }
  0xd3   :  { %1250 = vmatprep.subr.mxu0 %v435_v32  ;;  %1321 = vmatprep.subr.mxu1 %v437_v33  ;;  %v474_v32 = vld [vmem:[#allocation5 + $0xbe0] sm:$0xff]  ;;  %v476_v33 = vld [vmem:[#allocation5 + $0xbf0] sm:$0xff] }
  0xd4   :  { %1251 = vmatpush1.msra.mxu0 %v434_v34  ;;  %1322 = vmatpush1.msra.mxu1 %v436_v35  ;;  %v439_v34 = vld [vmem:[#allocation5 + $0xac8] sm:$0xff]  ;;  %v441_v35 = vld [vmem:[#allocation5 + $0xad8] sm:$0xff] }
  0xd5   :  { %1252 = vmatprep.subr.mxu0 %v399_v36  ;;  %1323 = vmatprep.subr.mxu1 %v401_v37  ;;  %v438_v36 = vld [vmem:[#allocation5 + $0xac0] sm:$0xff]  ;;  %v440_v37 = vld [vmem:[#allocation5 + $0xad0] sm:$0xff] }
  0xd6   :  { %1253 = vmatpush1.msra.mxu0 %v398_v38  ;;  %1324 = vmatpush1.msra.mxu1 %v400_v39  ;;  %v403_v38 = vld [vmem:[#allocation5 + $0x9a8] sm:$0xff]  ;;  %v405_v39 = vld [vmem:[#allocation5 + $0x9b8] sm:$0xff] }
  0xd7   :  { %1254 = vmatprep.subr.mxu0 %v363_v40  ;;  %1325 = vmatprep.subr.mxu1 %v365_v41  ;;  %v402_v40 = vld [vmem:[#allocation5 + $0x9a0] sm:$0xff]  ;;  %v404_v41 = vld [vmem:[#allocation5 + $0x9b0] sm:$0xff] }
  0xd8   :  { %1255 = vmatpush1.msra.mxu0 %v362_v42  ;;  %1326 = vmatpush1.msra.mxu1 %v364_v43  ;;  %v367_v42 = vld [vmem:[#allocation5 + $0x888] sm:$0xff]  ;;  %v369_v43 = vld [vmem:[#allocation5 + $0x898] sm:$0xff] }
  0xd9   :  { %1256 = vmatprep.subr.mxu0 %v327_v44  ;;  %1327 = vmatprep.subr.mxu1 %v329_v45  ;;  %v366_v44 = vld [vmem:[#allocation5 + $0x880] sm:$0xff]  ;;  %v368_v45 = vld [vmem:[#allocation5 + $0x890] sm:$0xff] }
  0xda   :  { %1257 = vmatpush1.msra.mxu0 %v326_v46  ;;  %1328 = vmatpush1.msra.mxu1 %v328_v47  ;;  %v331_v46 = vld [vmem:[#allocation5 + $0x768] sm:$0xff]  ;;  %v333_v47 = vld [vmem:[#allocation5 + $0x778] sm:$0xff] }
  0xdb   :  { %1258 = vmatprep.subr.mxu0 %v291_v48  ;;  %1329 = vmatprep.subr.mxu1 %v293_v49  ;;  %v330_v48 = vld [vmem:[#allocation5 + $0x760] sm:$0xff]  ;;  %v332_v49 = vld [vmem:[#allocation5 + $0x770] sm:$0xff] }
  0xdc   :  { %1259 = vmatpush1.msra.mxu0 %v290_v50  ;;  %1330 = vmatpush1.msra.mxu1 %v292_v51  ;;  %v295_v50 = vld [vmem:[#allocation5 + $0x648] sm:$0xff]  ;;  %v297_v51 = vld [vmem:[#allocation5 + $0x658] sm:$0xff] }
  0xdd   :  { %1260 = vmatprep.subr.mxu0 %v255_v52  ;;  %1331 = vmatprep.subr.mxu1 %v257_v53  ;;  %v294_v52 = vld [vmem:[#allocation5 + $0x640] sm:$0xff]  ;;  %v296_v53 = vld [vmem:[#allocation5 + $0x650] sm:$0xff] }
  0xde   :  { %1261 = vmatpush1.msra.mxu0 %v254_v54  ;;  %1332 = vmatpush1.msra.mxu1 %v256_v55  ;;  %v259_v54 = vld [vmem:[#allocation5 + $0x528] sm:$0xff]  ;;  %v261_v55 = vld [vmem:[#allocation5 + $0x538] sm:$0xff] }
  0xdf   :  { %1262 = vmatprep.subr.mxu0 %v219_v56  ;;  %1333 = vmatprep.subr.mxu1 %v221_v57  ;;  %v258_v56 = vld [vmem:[#allocation5 + $0x520] sm:$0xff]  ;;  %v260_v57 = vld [vmem:[#allocation5 + $0x530] sm:$0xff] }
  0xe0   :  { %1263 = vmatpush1.msra.mxu0 %v218_v58  ;;  %1334 = vmatpush1.msra.mxu1 %v220_v59  ;;  %v223_v58 = vld [vmem:[#allocation5 + $0x408] sm:$0xff]  ;;  %v225_v59 = vld [vmem:[#allocation5 + $0x418] sm:$0xff] }
  0xe1   :  { %1264 = vmatprep.subr.mxu0 %v183_v60  ;;  %1335 = vmatprep.subr.mxu1 %v185_v61  ;;  %v222_v60 = vld [vmem:[#allocation5 + $0x400] sm:$0xff]  ;;  %v224_v61 = vld [vmem:[#allocation5 + $0x410] sm:$0xff] }
  0xe2   :  { %1265 = vmatpush1.msra.mxu0 %v182_v62  ;;  %1336 = vmatpush1.msra.mxu1 %v184_v63  ;;  %v187_v62 = vld [vmem:[#allocation5 + $0x2e8] sm:$0xff]  ;;  %v189_v63 = vld [vmem:[#allocation5 + $0x2f8] sm:$0xff] }
  0xe3   :  { %1266 = vmatprep.subr.mxu0 %v147_v1  ;;  %1337 = vmatprep.subr.mxu1 %v149_v3  ;;  %v186_v1 = vld [vmem:[#allocation5 + $0x2e0] sm:$0xff]  ;;  %v188_v3 = vld [vmem:[#allocation5 + $0x2f0] sm:$0xff] }
  0xe4   :  { %1267 = vmatpush1.msra.mxu0 %v146_v4  ;;  %1338 = vmatpush1.msra.mxu1 %v148_v5  ;;  %v151_v4 = vld [vmem:[#allocation5 + $0x1c8] sm:$0xff]  ;;  %v153_v5 = vld [vmem:[#allocation5 + $0x1d8] sm:$0xff] }
  0xe5   :  { %1268 = vmatprep.subr.mxu0 %v111_v6  ;;  %1339 = vmatprep.subr.mxu1 %v113_v7  ;;  %v150_v6 = vld [vmem:[#allocation5 + $0x1c0] sm:$0xff]  ;;  %v152_v7 = vld [vmem:[#allocation5 + $0x1d0] sm:$0xff] }
  0xe6   :  { %1269 = vmatpush1.msra.mxu0 %v110_v8  ;;  %1302 = vmatprep.mubr.f32.mxu0 %v4222_v0  ;;  %v115_v8 = vld [vmem:[#allocation5 + $0xa8] sm:$0xff] }
  0xe7   :  { %1340 = vmatpush1.msra.mxu1 %v112_v9  ;;  %1303 = vmatmul.mubr.f32.vlgmr.msra.gmra.mxu0 %v4313_v12  ;;  %v117_v9 = vld [vmem:[#allocation5 + $0xb8] sm:$0xff] }
  0xe8   :  { %1373 = vmatprep.mubr.f32.mxu1 %v4222_v0  ;;  %1380 = vmatprep.subr.mxu0 %v655_v10  ;;  %v114_v10 = vld [vmem:[#allocation5 + $0xa0] sm:$0xff] }
  0xe9   :  { %1451 = vmatprep.subr.mxu1 %v657_v11  ;;  %1374 = vmatmul.mubr.f32.vlgmr.msra.gmra.mxu1 %v4313_v12  ;;  %v116_v11 = vld [vmem:[#allocation5 + $0xb0] sm:$0xff] }
  0xea   :  { %1381 = vmatpush1.msra.mxu0 %v654_v13  ;;  %1452 = vmatpush1.msra.mxu1 %v656_v14  ;;  %v659_v13 = vld [vmem:[#allocation5 + $0x11a8] sm:$0xff]  ;;  %v661_v14 = vld [vmem:[#allocation5 + $0x11b8] sm:$0xff] }
  0xeb   :  { %1382 = vmatprep.subr.mxu0 %v619_v15  ;;  %1453 = vmatprep.subr.mxu1 %v621_v16  ;;  %v658_v15 = vld [vmem:[#allocation5 + $0x11a0] sm:$0xff]  ;;  %v660_v16 = vld [vmem:[#allocation5 + $0x11b0] sm:$0xff] }
  0xec   :  { %1383 = vmatpush1.msra.mxu0 %v618_v17  ;;  %1454 = vmatpush1.msra.mxu1 %v620_v18  ;;  %v623_v17 = vld [vmem:[#allocation5 + $0x1088] sm:$0xff]  ;;  %v625_v18 = vld [vmem:[#allocation5 + $0x1098] sm:$0xff] }
  0xed   :  { %1384 = vmatprep.subr.mxu0 %v583_v19  ;;  %1455 = vmatprep.subr.mxu1 %v585_v20  ;;  %v622_v19 = vld [vmem:[#allocation5 + $0x1080] sm:$0xff]  ;;  %v624_v20 = vld [vmem:[#allocation5 + $0x1090] sm:$0xff] }
  0xee   :  { %1385 = vmatpush1.msra.mxu0 %v582_v21  ;;  %1456 = vmatpush1.msra.mxu1 %v584_v22  ;;  %v587_v21 = vld [vmem:[#allocation5 + $0xf68] sm:$0xff]  ;;  %v589_v22 = vld [vmem:[#allocation5 + $0xf78] sm:$0xff] }
  0xef   :  { %1386 = vmatprep.subr.mxu0 %v547_v23  ;;  %1457 = vmatprep.subr.mxu1 %v549_v24  ;;  %v586_v23 = vld [vmem:[#allocation5 + $0xf60] sm:$0xff]  ;;  %v588_v24 = vld [vmem:[#allocation5 + $0xf70] sm:$0xff] }
  0xf0   :  { %1387 = vmatpush1.msra.mxu0 %v546_v2  ;;  %1458 = vmatpush1.msra.mxu1 %v548_v25  ;;  %v551_v2 = vld [vmem:[#allocation5 + $0xe48] sm:$0xff]  ;;  %v553_v25 = vld [vmem:[#allocation5 + $0xe58] sm:$0xff] }
  0xf1   :  { %1388 = vmatprep.subr.mxu0 %v511_v26  ;;  %1459 = vmatprep.subr.mxu1 %v513_v27  ;;  %v550_v26 = vld [vmem:[#allocation5 + $0xe40] sm:$0xff]  ;;  %v552_v27 = vld [vmem:[#allocation5 + $0xe50] sm:$0xff] }
  0xf2   :  { %1389 = vmatpush1.msra.mxu0 %v510_v28  ;;  %1460 = vmatpush1.msra.mxu1 %v512_v29  ;;  %v515_v28 = vld [vmem:[#allocation5 + $0xd28] sm:$0xff]  ;;  %v517_v29 = vld [vmem:[#allocation5 + $0xd38] sm:$0xff] }
  0xf3   :  { %1390 = vmatprep.subr.mxu0 %v475_v30  ;;  %1461 = vmatprep.subr.mxu1 %v477_v31  ;;  %v514_v30 = vld [vmem:[#allocation5 + $0xd20] sm:$0xff]  ;;  %v516_v31 = vld [vmem:[#allocation5 + $0xd30] sm:$0xff] }
  0xf4   :  { %1391 = vmatpush1.msra.mxu0 %v474_v32  ;;  %1462 = vmatpush1.msra.mxu1 %v476_v33  ;;  %v479_v32 = vld [vmem:[#allocation5 + $0xc08] sm:$0xff]  ;;  %v481_v33 = vld [vmem:[#allocation5 + $0xc18] sm:$0xff] }
  0xf5   :  { %1392 = vmatprep.subr.mxu0 %v439_v34  ;;  %1463 = vmatprep.subr.mxu1 %v441_v35  ;;  %v478_v34 = vld [vmem:[#allocation5 + $0xc00] sm:$0xff]  ;;  %v480_v35 = vld [vmem:[#allocation5 + $0xc10] sm:$0xff] }
  0xf6   :  { %1393 = vmatpush1.msra.mxu0 %v438_v36  ;;  %1464 = vmatpush1.msra.mxu1 %v440_v37  ;;  %v443_v36 = vld [vmem:[#allocation5 + $0xae8] sm:$0xff]  ;;  %v445_v37 = vld [vmem:[#allocation5 + $0xaf8] sm:$0xff] }
  0xf7   :  { %1394 = vmatprep.subr.mxu0 %v403_v38  ;;  %1465 = vmatprep.subr.mxu1 %v405_v39  ;;  %v442_v38 = vld [vmem:[#allocation5 + $0xae0] sm:$0xff]  ;;  %v444_v39 = vld [vmem:[#allocation5 + $0xaf0] sm:$0xff] }
  0xf8   :  { %1395 = vmatpush1.msra.mxu0 %v402_v40  ;;  %1466 = vmatpush1.msra.mxu1 %v404_v41  ;;  %v407_v40 = vld [vmem:[#allocation5 + $0x9c8] sm:$0xff]  ;;  %v409_v41 = vld [vmem:[#allocation5 + $0x9d8] sm:$0xff] }
  0xf9   :  { %1396 = vmatprep.subr.mxu0 %v367_v42  ;;  %1467 = vmatprep.subr.mxu1 %v369_v43  ;;  %v406_v42 = vld [vmem:[#allocation5 + $0x9c0] sm:$0xff]  ;;  %v408_v43 = vld [vmem:[#allocation5 + $0x9d0] sm:$0xff] }
  0xfa   :  { %1397 = vmatpush1.msra.mxu0 %v366_v44  ;;  %1468 = vmatpush1.msra.mxu1 %v368_v45  ;;  %v371_v44 = vld [vmem:[#allocation5 + $0x8a8] sm:$0xff]  ;;  %v373_v45 = vld [vmem:[#allocation5 + $0x8b8] sm:$0xff] }
  0xfb   :  { %1398 = vmatprep.subr.mxu0 %v331_v46  ;;  %1469 = vmatprep.subr.mxu1 %v333_v47  ;;  %v370_v46 = vld [vmem:[#allocation5 + $0x8a0] sm:$0xff]  ;;  %v372_v47 = vld [vmem:[#allocation5 + $0x8b0] sm:$0xff] }
  0xfc   :  { %1399 = vmatpush1.msra.mxu0 %v330_v48  ;;  %1470 = vmatpush1.msra.mxu1 %v332_v49  ;;  %v335_v48 = vld [vmem:[#allocation5 + $0x788] sm:$0xff]  ;;  %v337_v49 = vld [vmem:[#allocation5 + $0x798] sm:$0xff] }
  0xfd   :  { %1400 = vmatprep.subr.mxu0 %v295_v50  ;;  %1471 = vmatprep.subr.mxu1 %v297_v51  ;;  %v334_v50 = vld [vmem:[#allocation5 + $0x780] sm:$0xff]  ;;  %v336_v51 = vld [vmem:[#allocation5 + $0x790] sm:$0xff] }
  0xfe   :  { %1401 = vmatpush1.msra.mxu0 %v294_v52  ;;  %1472 = vmatpush1.msra.mxu1 %v296_v53  ;;  %v299_v52 = vld [vmem:[#allocation5 + $0x668] sm:$0xff]  ;;  %v301_v53 = vld [vmem:[#allocation5 + $0x678] sm:$0xff] }
  0xff   :  { %1402 = vmatprep.subr.mxu0 %v259_v54  ;;  %1473 = vmatprep.subr.mxu1 %v261_v55  ;;  %v298_v54 = vld [vmem:[#allocation5 + $0x660] sm:$0xff]  ;;  %v300_v55 = vld [vmem:[#allocation5 + $0x670] sm:$0xff] }
 0x100   :  { %1403 = vmatpush1.msra.mxu0 %v258_v56  ;;  %1474 = vmatpush1.msra.mxu1 %v260_v57  ;;  %v263_v56 = vld [vmem:[#allocation5 + $0x548] sm:$0xff]  ;;  %v265_v57 = vld [vmem:[#allocation5 + $0x558] sm:$0xff] }
 0x101   :  { %1404 = vmatprep.subr.mxu0 %v223_v58  ;;  %1475 = vmatprep.subr.mxu1 %v225_v59  ;;  %v262_v58 = vld [vmem:[#allocation5 + $0x540] sm:$0xff]  ;;  %v264_v59 = vld [vmem:[#allocation5 + $0x550] sm:$0xff] }
 0x102   :  { %1405 = vmatpush1.msra.mxu0 %v222_v60  ;;  %1476 = vmatpush1.msra.mxu1 %v224_v61  ;;  %v227_v60 = vld [vmem:[#allocation5 + $0x428] sm:$0xff]  ;;  %v229_v61 = vld [vmem:[#allocation5 + $0x438] sm:$0xff] }
 0x103   :  { %1406 = vmatprep.subr.mxu0 %v187_v62  ;;  %1477 = vmatprep.subr.mxu1 %v189_v63  ;;  %v226_v62 = vld [vmem:[#allocation5 + $0x420] sm:$0xff]  ;;  %v228_v63 = vld [vmem:[#allocation5 + $0x430] sm:$0xff] }
 0x104   :  { %1407 = vmatpush1.msra.mxu0 %v186_v1  ;;  %1478 = vmatpush1.msra.mxu1 %v188_v3  ;;  %v191_v1 = vld [vmem:[#allocation5 + $0x308] sm:$0xff]  ;;  %v193_v3 = vld [vmem:[#allocation5 + $0x318] sm:$0xff] }
 0x105   :  { %1408 = vmatprep.subr.mxu0 %v151_v4  ;;  %1479 = vmatprep.subr.mxu1 %v153_v5  ;;  %v190_v4 = vld [vmem:[#allocation5 + $0x300] sm:$0xff]  ;;  %v192_v5 = vld [vmem:[#allocation5 + $0x310] sm:$0xff] }
 0x106   :  { %1409 = vmatpush1.msra.mxu0 %v150_v6  ;;  %1480 = vmatpush1.msra.mxu1 %v152_v7  ;;  %v155_v6 = vld [vmem:[#allocation5 + $0x1e8] sm:$0xff]  ;;  %v157_v7 = vld [vmem:[#allocation5 + $0x1f8] sm:$0xff] }
 0x107   :  { %1410 = vmatprep.subr.mxu0 %v115_v8  ;;  %1481 = vmatprep.subr.mxu1 %v117_v9  ;;  %v154_v8 = vld [vmem:[#allocation5 + $0x1e0] sm:$0xff]  ;;  %v156_v9 = vld [vmem:[#allocation5 + $0x1f0] sm:$0xff] }
 0x108   :  { %1411 = vmatpush1.msra.mxu0 %v114_v10  ;;  %1444 = vmatprep.mubr.f32.mxu0 %v4222_v0  ;;  %v119_v10 = vld [vmem:[#allocation5 + $0xc8] sm:$0xff] }
 0x109   :  { %1482 = vmatpush1.msra.mxu1 %v116_v11  ;;  %1445 = vmatmul.mubr.f32.vlgmr.msra.gmra.mxu0 %v4313_v12  ;;  %v121_v11 = vld [vmem:[#allocation5 + $0xd8] sm:$0xff] }
 0x10a   :  { %1515 = vmatprep.mubr.f32.mxu1 %v4222_v0  ;;  %1522 = vmatprep.subr.mxu0 %v659_v13  ;;  %v118_v13 = vld [vmem:[#allocation5 + $0xc0] sm:$0xff] }
 0x10b   :  { %1593 = vmatprep.subr.mxu1 %v661_v14  ;;  %1516 = vmatmul.mubr.f32.vlgmr.msra.gmra.mxu1 %v4313_v12  ;;  %v120_v14 = vld [vmem:[#allocation5 + $0xd0] sm:$0xff] }
 0x10c   :  { %1523 = vmatpush1.msra.mxu0 %v658_v15  ;;  %1594 = vmatpush1.msra.mxu1 %v660_v16  ;;  %v663_v15 = vld [vmem:[#allocation5 + $0x11c8] sm:$0xff]  ;;  %v665_v16 = vld [vmem:[#allocation5 + $0x11d8] sm:$0xff] }
 0x10d   :  { %1524 = vmatprep.subr.mxu0 %v623_v17  ;;  %1595 = vmatprep.subr.mxu1 %v625_v18  ;;  %v662_v17 = vld [vmem:[#allocation5 + $0x11c0] sm:$0xff]  ;;  %v664_v18 = vld [vmem:[#allocation5 + $0x11d0] sm:$0xff] }
 0x10e   :  { %1525 = vmatpush1.msra.mxu0 %v622_v19  ;;  %1596 = vmatpush1.msra.mxu1 %v624_v20  ;;  %v627_v19 = vld [vmem:[#allocation5 + $0x10a8] sm:$0xff]  ;;  %v629_v20 = vld [vmem:[#allocation5 + $0x10b8] sm:$0xff] }
 0x10f   :  { %1526 = vmatprep.subr.mxu0 %v587_v21  ;;  %1597 = vmatprep.subr.mxu1 %v589_v22  ;;  %v626_v21 = vld [vmem:[#allocation5 + $0x10a0] sm:$0xff]  ;;  %v628_v22 = vld [vmem:[#allocation5 + $0x10b0] sm:$0xff] }
 0x110   :  { %1527 = vmatpush1.msra.mxu0 %v586_v23  ;;  %1598 = vmatpush1.msra.mxu1 %v588_v24  ;;  %v591_v23 = vld [vmem:[#allocation5 + $0xf88] sm:$0xff]  ;;  %v593_v24 = vld [vmem:[#allocation5 + $0xf98] sm:$0xff] }
 0x111   :  { %1528 = vmatprep.subr.mxu0 %v551_v2  ;;  %1599 = vmatprep.subr.mxu1 %v553_v25  ;;  %v590_v2 = vld [vmem:[#allocation5 + $0xf80] sm:$0xff]  ;;  %v592_v25 = vld [vmem:[#allocation5 + $0xf90] sm:$0xff] }
 0x112   :  { %1529 = vmatpush1.msra.mxu0 %v550_v26  ;;  %1600 = vmatpush1.msra.mxu1 %v552_v27  ;;  %v555_v26 = vld [vmem:[#allocation5 + $0xe68] sm:$0xff]  ;;  %v557_v27 = vld [vmem:[#allocation5 + $0xe78] sm:$0xff] }
 0x113   :  { %1530 = vmatprep.subr.mxu0 %v515_v28  ;;  %1601 = vmatprep.subr.mxu1 %v517_v29  ;;  %v554_v28 = vld [vmem:[#allocation5 + $0xe60] sm:$0xff]  ;;  %v556_v29 = vld [vmem:[#allocation5 + $0xe70] sm:$0xff] }
 0x114   :  { %1531 = vmatpush1.msra.mxu0 %v514_v30  ;;  %1602 = vmatpush1.msra.mxu1 %v516_v31  ;;  %v519_v30 = vld [vmem:[#allocation5 + $0xd48] sm:$0xff]  ;;  %v521_v31 = vld [vmem:[#allocation5 + $0xd58] sm:$0xff] }
 0x115   :  { %1532 = vmatprep.subr.mxu0 %v479_v32  ;;  %1603 = vmatprep.subr.mxu1 %v481_v33  ;;  %v518_v32 = vld [vmem:[#allocation5 + $0xd40] sm:$0xff]  ;;  %v520_v33 = vld [vmem:[#allocation5 + $0xd50] sm:$0xff] }
 0x116   :  { %1533 = vmatpush1.msra.mxu0 %v478_v34  ;;  %1604 = vmatpush1.msra.mxu1 %v480_v35  ;;  %v483_v34 = vld [vmem:[#allocation5 + $0xc28] sm:$0xff]  ;;  %v485_v35 = vld [vmem:[#allocation5 + $0xc38] sm:$0xff] }
 0x117   :  { %1534 = vmatprep.subr.mxu0 %v443_v36  ;;  %1605 = vmatprep.subr.mxu1 %v445_v37  ;;  %v482_v36 = vld [vmem:[#allocation5 + $0xc20] sm:$0xff]  ;;  %v484_v37 = vld [vmem:[#allocation5 + $0xc30] sm:$0xff] }
 0x118   :  { %1535 = vmatpush1.msra.mxu0 %v442_v38  ;;  %1606 = vmatpush1.msra.mxu1 %v444_v39  ;;  %v447_v38 = vld [vmem:[#allocation5 + $0xb08] sm:$0xff]  ;;  %v449_v39 = vld [vmem:[#allocation5 + $0xb18] sm:$0xff] }
 0x119   :  { %1536 = vmatprep.subr.mxu0 %v407_v40  ;;  %1607 = vmatprep.subr.mxu1 %v409_v41  ;;  %v446_v40 = vld [vmem:[#allocation5 + $0xb00] sm:$0xff]  ;;  %v448_v41 = vld [vmem:[#allocation5 + $0xb10] sm:$0xff] }
 0x11a   :  { %1537 = vmatpush1.msra.mxu0 %v406_v42  ;;  %1608 = vmatpush1.msra.mxu1 %v408_v43  ;;  %v411_v42 = vld [vmem:[#allocation5 + $0x9e8] sm:$0xff]  ;;  %v413_v43 = vld [vmem:[#allocation5 + $0x9f8] sm:$0xff] }
 0x11b   :  { %1538 = vmatprep.subr.mxu0 %v371_v44  ;;  %1609 = vmatprep.subr.mxu1 %v373_v45  ;;  %v410_v44 = vld [vmem:[#allocation5 + $0x9e0] sm:$0xff]  ;;  %v412_v45 = vld [vmem:[#allocation5 + $0x9f0] sm:$0xff] }
 0x11c   :  { %1539 = vmatpush1.msra.mxu0 %v370_v46  ;;  %1610 = vmatpush1.msra.mxu1 %v372_v47  ;;  %v375_v46 = vld [vmem:[#allocation5 + $0x8c8] sm:$0xff]  ;;  %v377_v47 = vld [vmem:[#allocation5 + $0x8d8] sm:$0xff] }
 0x11d   :  { %1540 = vmatprep.subr.mxu0 %v335_v48  ;;  %1611 = vmatprep.subr.mxu1 %v337_v49  ;;  %v374_v48 = vld [vmem:[#allocation5 + $0x8c0] sm:$0xff]  ;;  %v376_v49 = vld [vmem:[#allocation5 + $0x8d0] sm:$0xff] }
 0x11e   :  { %1541 = vmatpush1.msra.mxu0 %v334_v50  ;;  %1612 = vmatpush1.msra.mxu1 %v336_v51  ;;  %v339_v50 = vld [vmem:[#allocation5 + $0x7a8] sm:$0xff]  ;;  %v341_v51 = vld [vmem:[#allocation5 + $0x7b8] sm:$0xff] }
 0x11f   :  { %1542 = vmatprep.subr.mxu0 %v299_v52  ;;  %1613 = vmatprep.subr.mxu1 %v301_v53  ;;  %v338_v52 = vld [vmem:[#allocation5 + $0x7a0] sm:$0xff]  ;;  %v340_v53 = vld [vmem:[#allocation5 + $0x7b0] sm:$0xff] }
 0x120   :  { %1543 = vmatpush1.msra.mxu0 %v298_v54  ;;  %1614 = vmatpush1.msra.mxu1 %v300_v55  ;;  %v303_v54 = vld [vmem:[#allocation5 + $0x688] sm:$0xff]  ;;  %v305_v55 = vld [vmem:[#allocation5 + $0x698] sm:$0xff] }
 0x121   :  { %1544 = vmatprep.subr.mxu0 %v263_v56  ;;  %1615 = vmatprep.subr.mxu1 %v265_v57  ;;  %v302_v56 = vld [vmem:[#allocation5 + $0x680] sm:$0xff]  ;;  %v304_v57 = vld [vmem:[#allocation5 + $0x690] sm:$0xff] }
 0x122   :  { %1545 = vmatpush1.msra.mxu0 %v262_v58  ;;  %1616 = vmatpush1.msra.mxu1 %v264_v59  ;;  %v267_v58 = vld [vmem:[#allocation5 + $0x568] sm:$0xff]  ;;  %v269_v59 = vld [vmem:[#allocation5 + $0x578] sm:$0xff] }
 0x123   :  { %1546 = vmatprep.subr.mxu0 %v227_v60  ;;  %1617 = vmatprep.subr.mxu1 %v229_v61  ;;  %v266_v60 = vld [vmem:[#allocation5 + $0x560] sm:$0xff]  ;;  %v268_v61 = vld [vmem:[#allocation5 + $0x570] sm:$0xff] }
 0x124   :  { %1547 = vmatpush1.msra.mxu0 %v226_v62  ;;  %1618 = vmatpush1.msra.mxu1 %v228_v63  ;;  %v231_v62 = vld [vmem:[#allocation5 + $0x448] sm:$0xff]  ;;  %v233_v63 = vld [vmem:[#allocation5 + $0x458] sm:$0xff] }
 0x125   :  { %1548 = vmatprep.subr.mxu0 %v191_v1  ;;  %1619 = vmatprep.subr.mxu1 %v193_v3  ;;  %v230_v1 = vld [vmem:[#allocation5 + $0x440] sm:$0xff]  ;;  %v232_v3 = vld [vmem:[#allocation5 + $0x450] sm:$0xff] }
 0x126   :  { %1549 = vmatpush1.msra.mxu0 %v190_v4  ;;  %1620 = vmatpush1.msra.mxu1 %v192_v5  ;;  %v195_v4 = vld [vmem:[#allocation5 + $0x328] sm:$0xff]  ;;  %v197_v5 = vld [vmem:[#allocation5 + $0x338] sm:$0xff] }
 0x127   :  { %1550 = vmatprep.subr.mxu0 %v155_v6  ;;  %1621 = vmatprep.subr.mxu1 %v157_v7  ;;  %v194_v6 = vld [vmem:[#allocation5 + $0x320] sm:$0xff]  ;;  %v196_v7 = vld [vmem:[#allocation5 + $0x330] sm:$0xff] }
 0x128   :  { %1551 = vmatpush1.msra.mxu0 %v154_v8  ;;  %1622 = vmatpush1.msra.mxu1 %v156_v9  ;;  %v159_v8 = vld [vmem:[#allocation5 + $0x208] sm:$0xff]  ;;  %v161_v9 = vld [vmem:[#allocation5 + $0x218] sm:$0xff] }
 0x129   :  { %1552 = vmatprep.subr.mxu0 %v119_v10  ;;  %1623 = vmatprep.subr.mxu1 %v121_v11  ;;  %v158_v10 = vld [vmem:[#allocation5 + $0x200] sm:$0xff]  ;;  %v160_v11 = vld [vmem:[#allocation5 + $0x210] sm:$0xff] }
 0x12a   :  { %1553 = vmatpush1.msra.mxu0 %v118_v13  ;;  %1586 = vmatprep.mubr.f32.mxu0 %v4222_v0  ;;  %v123_v13 = vld [vmem:[#allocation5 + $0xe8] sm:$0xff] }
 0x12b   :  { %1624 = vmatpush1.msra.mxu1 %v120_v14  ;;  %1587 = vmatmul.mubr.f32.vlgmr.msra.gmra.mxu0 %v4313_v12  ;;  %v125_v14 = vld [vmem:[#allocation5 + $0xf8] sm:$0xff] }
 0x12c   :  { %1657 = vmatprep.mubr.f32.mxu1 %v4222_v0  ;;  %1664 = vmatprep.subr.mxu0 %v663_v15  ;;  %v122_v15 = vld [vmem:[#allocation5 + $0xe0] sm:$0xff] }
 0x12d   :  { %1735 = vmatprep.subr.mxu1 %v665_v16  ;;  %1658 = vmatmul.mubr.f32.vlgmr.msra.gmra.mxu1 %v4313_v12  ;;  %v124_v16 = vld [vmem:[#allocation5 + $0xf0] sm:$0xff] }
 0x12e   :  { %1665 = vmatpush1.msra.mxu0 %v662_v17  ;;  %1736 = vmatpush1.msra.mxu1 %v664_v18  ;;  %v667_v17 = vld [vmem:[#allocation5 + $0x11e8] sm:$0xff]  ;;  %v669_v18 = vld [vmem:[#allocation5 + $0x11f8] sm:$0xff] }
 0x12f   :  { %1666 = vmatprep.subr.mxu0 %v627_v19  ;;  %1737 = vmatprep.subr.mxu1 %v629_v20  ;;  %v666_v19 = vld [vmem:[#allocation5 + $0x11e0] sm:$0xff]  ;;  %v668_v20 = vld [vmem:[#allocation5 + $0x11f0] sm:$0xff] }
 0x130   :  { %1667 = vmatpush1.msra.mxu0 %v626_v21  ;;  %1738 = vmatpush1.msra.mxu1 %v628_v22  ;;  %v631_v21 = vld [vmem:[#allocation5 + $0x10c8] sm:$0xff]  ;;  %v633_v22 = vld [vmem:[#allocation5 + $0x10d8] sm:$0xff] }
 0x131   :  { %1668 = vmatprep.subr.mxu0 %v591_v23  ;;  %1739 = vmatprep.subr.mxu1 %v593_v24  ;;  %v630_v23 = vld [vmem:[#allocation5 + $0x10c0] sm:$0xff]  ;;  %v632_v24 = vld [vmem:[#allocation5 + $0x10d0] sm:$0xff] }
 0x132   :  { %1669 = vmatpush1.msra.mxu0 %v590_v2  ;;  %1740 = vmatpush1.msra.mxu1 %v592_v25  ;;  %v595_v2 = vld [vmem:[#allocation5 + $0xfa8] sm:$0xff]  ;;  %v597_v25 = vld [vmem:[#allocation5 + $0xfb8] sm:$0xff] }
 0x133   :  { %1670 = vmatprep.subr.mxu0 %v555_v26  ;;  %1741 = vmatprep.subr.mxu1 %v557_v27  ;;  %v594_v26 = vld [vmem:[#allocation5 + $0xfa0] sm:$0xff]  ;;  %v596_v27 = vld [vmem:[#allocation5 + $0xfb0] sm:$0xff] }
 0x134   :  { %1671 = vmatpush1.msra.mxu0 %v554_v28  ;;  %1742 = vmatpush1.msra.mxu1 %v556_v29  ;;  %v559_v28 = vld [vmem:[#allocation5 + $0xe88] sm:$0xff]  ;;  %v561_v29 = vld [vmem:[#allocation5 + $0xe98] sm:$0xff] }
 0x135   :  { %1672 = vmatprep.subr.mxu0 %v519_v30  ;;  %1743 = vmatprep.subr.mxu1 %v521_v31  ;;  %v558_v30 = vld [vmem:[#allocation5 + $0xe80] sm:$0xff]  ;;  %v560_v31 = vld [vmem:[#allocation5 + $0xe90] sm:$0xff] }
 0x136   :  { %1673 = vmatpush1.msra.mxu0 %v518_v32  ;;  %1744 = vmatpush1.msra.mxu1 %v520_v33  ;;  %v525_v32 = vld [vmem:[#allocation5 + $0xd78] sm:$0xff]  ;;  %v522_v33 = vld [vmem:[#allocation5 + $0xd60] sm:$0xff] }
 0x137   :  { %1674 = vmatprep.subr.mxu0 %v483_v34  ;;  %1745 = vmatprep.subr.mxu1 %v485_v35  ;;  %v524_v34 = vld [vmem:[#allocation5 + $0xd70] sm:$0xff]  ;;  %v487_v35 = vld [vmem:[#allocation5 + $0xc48] sm:$0xff] }
 0x138   :  { %1675 = vmatpush1.msra.mxu0 %v482_v36  ;;  %1746 = vmatpush1.msra.mxu1 %v484_v37  ;;  %v489_v36 = vld [vmem:[#allocation5 + $0xc58] sm:$0xff]  ;;  %v486_v37 = vld [vmem:[#allocation5 + $0xc40] sm:$0xff] }
 0x139   :  { %1676 = vmatprep.subr.mxu0 %v447_v38  ;;  %1747 = vmatprep.subr.mxu1 %v449_v39  ;;  %v488_v38 = vld [vmem:[#allocation5 + $0xc50] sm:$0xff]  ;;  %v451_v39 = vld [vmem:[#allocation5 + $0xb28] sm:$0xff] }
 0x13a   :  { %1677 = vmatpush1.msra.mxu0 %v446_v40  ;;  %1748 = vmatpush1.msra.mxu1 %v448_v41  ;;  %v453_v40 = vld [vmem:[#allocation5 + $0xb38] sm:$0xff]  ;;  %v450_v41 = vld [vmem:[#allocation5 + $0xb20] sm:$0xff] }
 0x13b   :  { %1678 = vmatprep.subr.mxu0 %v411_v42  ;;  %1749 = vmatprep.subr.mxu1 %v413_v43  ;;  %v452_v42 = vld [vmem:[#allocation5 + $0xb30] sm:$0xff]  ;;  %v415_v43 = vld [vmem:[#allocation5 + $0xa08] sm:$0xff] }
 0x13c   :  { %1679 = vmatpush1.msra.mxu0 %v410_v44  ;;  %1750 = vmatpush1.msra.mxu1 %v412_v45  ;;  %v417_v44 = vld [vmem:[#allocation5 + $0xa18] sm:$0xff]  ;;  %v414_v45 = vld [vmem:[#allocation5 + $0xa00] sm:$0xff] }
 0x13d   :  { %1680 = vmatprep.subr.mxu0 %v375_v46  ;;  %1751 = vmatprep.subr.mxu1 %v377_v47  ;;  %v416_v46 = vld [vmem:[#allocation5 + $0xa10] sm:$0xff]  ;;  %v379_v47 = vld [vmem:[#allocation5 + $0x8e8] sm:$0xff] }
 0x13e   :  { %1681 = vmatpush1.msra.mxu0 %v374_v48  ;;  %1752 = vmatpush1.msra.mxu1 %v376_v49  ;;  %v381_v48 = vld [vmem:[#allocation5 + $0x8f8] sm:$0xff]  ;;  %v378_v49 = vld [vmem:[#allocation5 + $0x8e0] sm:$0xff] }
 0x13f   :  { %1682 = vmatprep.subr.mxu0 %v339_v50  ;;  %1753 = vmatprep.subr.mxu1 %v341_v51  ;;  %v380_v50 = vld [vmem:[#allocation5 + $0x8f0] sm:$0xff]  ;;  %v343_v51 = vld [vmem:[#allocation5 + $0x7c8] sm:$0xff] }
 0x140   :  { %1683 = vmatpush1.msra.mxu0 %v338_v52  ;;  %1754 = vmatpush1.msra.mxu1 %v340_v53  ;;  %v345_v52 = vld [vmem:[#allocation5 + $0x7d8] sm:$0xff]  ;;  %v342_v53 = vld [vmem:[#allocation5 + $0x7c0] sm:$0xff] }
 0x141   :  { %1684 = vmatprep.subr.mxu0 %v303_v54  ;;  %1755 = vmatprep.subr.mxu1 %v305_v55  ;;  %v344_v54 = vld [vmem:[#allocation5 + $0x7d0] sm:$0xff]  ;;  %v307_v55 = vld [vmem:[#allocation5 + $0x6a8] sm:$0xff] }
 0x142   :  { %1685 = vmatpush1.msra.mxu0 %v302_v56  ;;  %1756 = vmatpush1.msra.mxu1 %v304_v57  ;;  %v309_v56 = vld [vmem:[#allocation5 + $0x6b8] sm:$0xff]  ;;  %v306_v57 = vld [vmem:[#allocation5 + $0x6a0] sm:$0xff] }
 0x143   :  { %1686 = vmatprep.subr.mxu0 %v267_v58  ;;  %1757 = vmatprep.subr.mxu1 %v269_v59  ;;  %v308_v58 = vld [vmem:[#allocation5 + $0x6b0] sm:$0xff]  ;;  %v271_v59 = vld [vmem:[#allocation5 + $0x588] sm:$0xff] }
 0x144   :  { %1687 = vmatpush1.msra.mxu0 %v266_v60  ;;  %1758 = vmatpush1.msra.mxu1 %v268_v61  ;;  %v273_v60 = vld [vmem:[#allocation5 + $0x598] sm:$0xff]  ;;  %v270_v61 = vld [vmem:[#allocation5 + $0x580] sm:$0xff] }
 0x145   :  { %1688 = vmatprep.subr.mxu0 %v231_v62  ;;  %1759 = vmatprep.subr.mxu1 %v233_v63  ;;  %v272_v62 = vld [vmem:[#allocation5 + $0x590] sm:$0xff]  ;;  %v4330_v63 = vpop.f32.mrf.mxu1 }
 0x146   :  { %1689 = vmatpush1.msra.mxu0 %v230_v1  ;;  %1760 = vmatpush1.msra.mxu1 %v232_v3  ;;  %v235_v1 = vld [vmem:[#allocation5 + $0x468] sm:$0xff]  ;;  %v237_v3 = vld [vmem:[#allocation5 + $0x478] sm:$0xff] }
 0x147   :  { %1690 = vmatprep.subr.mxu0 %v195_v4  ;;  %1761 = vmatprep.subr.mxu1 %v197_v5  ;;  %v234_v4 = vld [vmem:[#allocation5 + $0x460] sm:$0xff]  ;;  %v236_v5 = vld [vmem:[#allocation5 + $0x470] sm:$0xff] }
 0x148   :  { %1691 = vmatpush1.msra.mxu0 %v194_v6  ;;  %1762 = vmatpush1.msra.mxu1 %v196_v7  ;;  %v736_v6 = vpop.f32.mrf.mxu0  ;;  %v199_v7 = vld [vmem:[#allocation5 + $0x348] sm:$0xff] }
 0x149   :  { %1692 = vmatprep.subr.mxu0 %v159_v8  ;;  %1763 = vmatprep.subr.mxu1 %v161_v9  ;;  %v201_v8 = vld [vmem:[#allocation5 + $0x358] sm:$0xff]  ;;  %v198_v9 = vld [vmem:[#allocation5 + $0x340] sm:$0xff] }
 0x14a   :  { %1693 = vmatpush1.msra.mxu0 %v158_v10  ;;  %1764 = vmatpush1.msra.mxu1 %v160_v11  ;;  %v200_v10 = vld [vmem:[#allocation5 + $0x350] sm:$0xff]  ;;  %v809_v11 = vpop.f32.mrf.mxu1 }
 0x14b   :  { %1694 = vmatprep.subr.mxu0 %v123_v13  ;;  %1765 = vmatprep.subr.mxu1 %v125_v14  ;;  %v163_v13 = vld [vmem:[#allocation5 + $0x228] sm:$0xff]  ;;  %v165_v14 = vld [vmem:[#allocation5 + $0x238] sm:$0xff] }
 0x14c   :  { %1695 = vmatpush1.msra.mxu0 %v122_v15  ;;  %1728 = vmatprep.mubr.f32.mxu0 %v4222_v0  ;;  %v162_v15 = vld [vmem:[#allocation5 + $0x220] sm:$0xff] }
 0x14d   :  { %1766 = vmatpush1.msra.mxu1 %v124_v16  ;;  %1729 = vmatmul.mubr.f32.vlgmr.msra.gmra.mxu0 %v4313_v12  ;;  %v164_v16 = vld [vmem:[#allocation5 + $0x230] sm:$0xff] }
 0x14e   :  { %1799 = vmatprep.mubr.f32.mxu1 %v4222_v0  ;;  %1806 = vmatprep.subr.mxu0 %v667_v17  ;;  %v738_v17 = vpop.f32.mrf.mxu0 }
 0x14f   :  { %1877 = vmatprep.subr.mxu1 %v669_v18  ;;  %1800 = vmatmul.mubr.f32.vlgmr.msra.gmra.mxu1 %v4313_v12  ;;  %v523_v12 = vld [vmem:[#allocation5 + $0xd68] sm:$0xff]  ;;  %v949_v18 = vpop.f32.mrf.mxu1 }
 0x150   :  { %1807 = vmatpush1.msra.mxu0 %v666_v19  ;;  %1878 = vmatpush1.msra.mxu1 %v668_v20  ;;  %v127_v19 = vld [vmem:[#allocation5 + $0x108] sm:$0xff]  ;;  %v129_v20 = vld [vmem:[#allocation5 + $0x118] sm:$0xff] }
 0x151   :  { %1808 = vmatprep.subr.mxu0 %v631_v21  ;;  %1879 = vmatprep.subr.mxu1 %v633_v22  ;;  %v126_v21 = vld [vmem:[#allocation5 + $0x100] sm:$0xff]  ;;  %v878_v22 = vpop.f32.mrf.mxu0 }
 0x152   :  { %1809 = vmatpush1.msra.mxu0 %v630_v23  ;;  %1880 = vmatpush1.msra.mxu1 %v632_v24  ;;  %v128_v23 = vld [vmem:[#allocation5 + $0x110] sm:$0xff]  ;;  %v951_v24 = vpop.f32.mrf.mxu1 }
 0x153   :  { %1810 = vmatprep.subr.mxu0 %v595_v2  ;;  %1881 = vmatprep.subr.mxu1 %v597_v25  ;;  %v880_v2 = vpop.f32.mrf.mxu0  ;;  %v4086_v25 = vld [vmem:[#allocation2] sm:$0xf] }
 0x154   :  { %1811 = vmatpush1.msra.mxu0 %v594_v26  ;;  %1882 = vmatpush1.msra.mxu1 %v596_v27 }
 0x155   :  { %1812 = vmatprep.subr.mxu0 %v559_v28  ;;  %1883 = vmatprep.subr.mxu1 %v561_v29  ;;  %v3972_v28 = vld [vmem:[%s4532_s2 + $0x8] sm:$0xff] }
 0x156   :  { %1813 = vmatpush1.msra.mxu0 %v558_v30  ;;  %1884 = vmatpush1.msra.mxu1 %v560_v31  ;;  %v1948_v31 = vld [vmem:[%s4532_s2] sm:$0xff] }
 0x157   :  { %1814 = vmatprep.subr.mxu0 %v523_v12  ;;  %1885 = vmatprep.subr.mxu1 %v525_v32  ;;  %v3985_v12 = vld [vmem:[%s4532_s2 + $0x10] sm:$0xff] }
 0x158   :  { %1815 = vmatpush1.msra.mxu0 %v522_v33  ;;  %1886 = vmatpush1.msra.mxu1 %v524_v34 }
 0x159   :  { %1816 = vmatprep.subr.mxu0 %v487_v35  ;;  %1887 = vmatprep.subr.mxu1 %v489_v36  ;;  %v3992_v35 = vld [vmem:[%s4532_s2 + $0x18] sm:$0xff] }
 0x15a   :  { %1817 = vmatpush1.msra.mxu0 %v486_v37  ;;  %1888 = vmatpush1.msra.mxu1 %v488_v38 }
 0x15b   :  { %1818 = vmatprep.subr.mxu0 %v451_v39  ;;  %1889 = vmatprep.subr.mxu1 %v453_v40  ;;  %v3999_v40 = vld [vmem:[%s4532_s2 + $0x20] sm:$0xff] }
 0x15c   :  { %1819 = vmatpush1.msra.mxu0 %v450_v41  ;;  %1890 = vmatpush1.msra.mxu1 %v452_v42  ;;  %v4395_v42 = vld [vmem:[%s4533_s3] sm:$0xff] }
 0x15d   :  { %1820 = vmatprep.subr.mxu0 %v415_v43  ;;  %1891 = vmatprep.subr.mxu1 %v417_v44  ;;  %v4223_v43 = vmov 0   ;;  %v4401_v44 = vld [vmem:[%s4536_s6] sm:$0xff] }
 0x15e   :  { %1821 = vmatpush1.msra.mxu0 %v414_v45  ;;  %1892 = vmatpush1.msra.mxu1 %v416_v46 }
 0x15f   :  { %1822 = vmatprep.subr.mxu0 %v379_v47  ;;  %1893 = vmatprep.subr.mxu1 %v381_v48  ;;  %v4006_v48 = vld [vmem:[%s4532_s2 + $0x28] sm:$0xff] }
 0x160   :  { %1823 = vmatpush1.msra.mxu0 %v378_v49  ;;  %1894 = vmatpush1.msra.mxu1 %v380_v50 }
 0x161   :  { %1824 = vmatprep.subr.mxu0 %v343_v51  ;;  %1895 = vmatprep.subr.mxu1 %v345_v52 }
 0x162   :  { %1825 = vmatpush1.msra.mxu0 %v342_v53  ;;  %1896 = vmatpush1.msra.mxu1 %v344_v54  ;;  %v4013_v53 = vld [vmem:[%s4532_s2 + $0x30] sm:$0xff] }
 0x163   :  { %1826 = vmatprep.subr.mxu0 %v307_v55  ;;  %1897 = vmatprep.subr.mxu1 %v309_v56  ;;  %v1020_v27 = vpop.f32.mrf.mxu0 }
 0x164   :  { %1827 = vmatpush1.msra.mxu0 %v306_v57  ;;  %1898 = vmatpush1.msra.mxu1 %v308_v58  ;;  %v4020_v58 = vld [vmem:[%s4532_s2 + $0x38] sm:$0xff] }
 0x165   :  { %1828 = vmatprep.subr.mxu0 %v271_v59  ;;  %1899 = vmatprep.subr.mxu1 %v273_v60  ;;  %v1091_v26 = vpop.f32.mrf.mxu1  ;;  %v1022_v30 = vpop.f32.mrf.mxu0  ;;  %v3461_v60 = vld [vmem:[#allocation7] sm:$0xff] }
 0x166   :  { %1829 = vmatpush1.msra.mxu0 %v270_v61  ;;  %1900 = vmatpush1.msra.mxu1 %v272_v62  ;;  %v3462_v61 = vld [vmem:[#allocation7 + $0x8] sm:$0xff] }
 0x167   :  { %1830 = vmatprep.subr.mxu0 %v235_v1  ;;  %1901 = vmatprep.subr.mxu1 %v237_v3  ;;  %v1093_v29 = vpop.f32.mrf.mxu1 }
 0x168   :  { %1831 = vmatpush1.msra.mxu0 %v234_v4  ;;  %1902 = vmatpush1.msra.mxu1 %v236_v5  ;;  %v4027_v4 = vld [vmem:[%s4532_s2 + $0x40] sm:$0xff]  ;;  %v3471_v5 = vcombine.high %v3461_v60, %v3461_v60 }
 0x169   :  { %1832 = vmatprep.subr.mxu0 %v199_v7  ;;  %1903 = vmatprep.subr.mxu1 %v201_v8  ;;  %v3460_v7 = vld [vmem:[%s4535_s5] sm:$0xff]  ;;  %s4226_s5 = smov 127  }
 0x16a   :  { %1833 = vmatpush1.msra.mxu0 %v198_v9  ;;  %1904 = vmatpush1.msra.mxu1 %v200_v10 }
 0x16b   :  { %1834 = vmatprep.subr.mxu0 %v163_v13  ;;  %1905 = vmatprep.subr.mxu1 %v165_v14 }
 0x16c   :  { %1835 = vmatpush1.msra.mxu0 %v162_v15  ;;  %1906 = vmatpush1.msra.mxu1 %v164_v16 }
 0x16d   :  { %1836 = vmatprep.subr.mxu0 %v127_v19  ;;  %1907 = vmatprep.subr.mxu1 %v129_v20 }
 0x16e   :  { %1837 = vmatpush1.msra.mxu0 %v126_v21  ;;  %1870 = vmatprep.mubr.f32.mxu0 %v4222_v0 }
 0x16f   :  { %1908 = vmatpush1.msra.mxu1 %v128_v23  ;;  %1941 = vmatprep.mubr.f32.mxu1 %v4222_v0 }
 0x170   :  { %1871 = vmatmul.mubr.f32.vlgmr.msra.gmra.mxu0 %v4086_v25  ;;  %1942 = vmatmul.mubr.f32.vlgmr.msra.gmra.mxu1 %v4086_v25 }
 0x171   :  { %3973 = vmatprep.subr.msk.mxu0 %vm1955_vm0, %v880_v2  ;;  %3976 = vmatprep.subr.msk.mxu1 %vm1955_vm0, %v951_v24 }
 0x172   :  { %3974 = vmatpush1.msk.msra.mxu0 %vm1955_vm0, %v878_v22  ;;  %3977 = vmatpush1.msk.msra.mxu1 %vm1955_vm0, %v949_v18 }
 0x173   :  { %3979 = vmatprep.subr.msk.mxu0 %vm1955_vm0, %v738_v17  ;;  %3982 = vmatprep.subr.msk.mxu1 %vm1955_vm0, %v809_v11 }
 0x174   :  { %2032 = vmatprep.mubr.f32.mxu0 %v4222_v0  ;;  %2103 = vmatprep.mubr.f32.mxu1 %v4222_v0 }
 0x175   :  { %3975 = vmatmul.mubr.msk.f32.vlgmr.msra.gmra.mxu0 %vm1951_vm1, %v3972_v28  ;;  %3978 = vmatmul.mubr.msk.f32.vlgmr.msra.gmra.mxu1 %vm1951_vm1, %v3972_v28 }
 0x176   :  { %3980 = vmatpush1.msk.msra.mxu0 %vm1955_vm0, %v736_v6  ;;  %3983 = vmatpush1.msk.msra.mxu1 %vm1955_vm0, %v4330_v63  ;;  %v3472_v6 = vcombine.high %v3462_v61, %v3462_v61 }
 0x177   :  { %3986 = vmatprep.subr.msk.mxu0 %vm1955_vm0, %v1022_v30  ;;  %3989 = vmatprep.subr.msk.mxu1 %vm1955_vm0, %v1093_v29 }
 0x178   :  { %2189 = vmatprep.mubr.f32.mxu0 %v4222_v0  ;;  %2260 = vmatprep.mubr.f32.mxu1 %v4222_v0 }
 0x179   :  { %3981 = vmatmul.mubr.msk.f32.vlgmr.msra.gmra.mxu0 %vm1951_vm1, %v1948_v31  ;;  %3984 = vmatmul.mubr.msk.f32.vlgmr.msra.gmra.mxu1 %vm1951_vm1, %v1948_v31 }
 0x17a   :  { %3987 = vmatpush1.msk.msra.mxu0 %vm1955_vm0, %v1020_v27  ;;  %3990 = vmatpush1.msk.msra.mxu1 %vm1955_vm0, %v1091_v26 }
 0x17b   :  { %2348 = vmatprep.mubr.f32.mxu0 %v4222_v0  ;;  %2419 = vmatprep.mubr.f32.mxu1 %v4222_v0 }
 0x17c   :  { %4056 = vset.pattern.permute.xlu0 %v4223_v43 }
 0x17d   :  { %3988 = vmatmul.mubr.msk.f32.vlgmr.msra.gmra.mxu0 %vm1951_vm1, %v3985_v12  ;;  %3991 = vmatmul.mubr.msk.f32.vlgmr.msra.gmra.mxu1 %vm1951_vm1, %v3985_v12 }
 0x17e   :  { %2511 = vmatprep.mubr.f32.mxu0 %v4222_v0  ;;  %2582 = vmatprep.mubr.f32.mxu1 %v4222_v0 }
 0x17f   :  { %3411 = vperm.xlu0 %4056, %v4395_v42  }
 0x183   :  { %3466 = vperm.xlu0 %4056, %v4401_v44  }
 0x185   :  { %v1162_v32 = vpop.f32.mrf.mxu0 }
 0x187   :  { %v1164_v33 = vpop.f32.mrf.mxu0  ;;  %v1233_v34 = vpop.f32.mrf.mxu1 }
 0x188   :  { %3993 = vmatprep.subr.msk.mxu0 %vm1955_vm0, %v1164_v33 }
 0x189   :  { %v1235_v36 = vpop.f32.mrf.mxu1  ;;  %3994 = vmatpush1.msk.msra.mxu0 %vm1955_vm0, %v1162_v32 }
 0x18a   :  { %3996 = vmatprep.subr.msk.mxu1 %vm1955_vm0, %v1235_v36  ;;  %3995 = vmatmul.mubr.msk.f32.vlgmr.msra.gmra.mxu0 %vm1951_vm1, %v3992_v35 }
 0x18b   :  { %3997 = vmatpush1.msk.msra.mxu1 %vm1955_vm0, %v1233_v34  ;;  %2674 = vmatprep.mubr.f32.mxu0 %v4222_v0 }
 0x18c   :  { %3998 = vmatmul.mubr.msk.f32.vlgmr.msra.gmra.mxu1 %vm1951_vm1, %v3992_v35 }
 0x18d   :  { %2745 = vmatprep.mubr.f32.mxu1 %v4222_v0 }
 0x1a7   :  { %v1304_v37 = vpop.f32.mrf.mxu0 }
 0x1a9   :  { %v1306_v38 = vpop.f32.mrf.mxu0  ;;  %v1375_v39 = vpop.f32.mrf.mxu1 }
 0x1aa   :  { %4000 = vmatprep.subr.msk.mxu0 %vm1955_vm0, %v1306_v38 }
 0x1ab   :  { %v1377_v41 = vpop.f32.mrf.mxu1  ;;  %4001 = vmatpush1.msk.msra.mxu0 %vm1955_vm0, %v1304_v37 }
 0x1ac   :  { %4003 = vmatprep.subr.msk.mxu1 %vm1955_vm0, %v1377_v41  ;;  %4002 = vmatmul.mubr.msk.f32.vlgmr.msra.gmra.mxu0 %vm1951_vm1, %v3999_v40 }
 0x1ad   :  { %4004 = vmatpush1.msk.msra.mxu1 %vm1955_vm0, %v1375_v39  ;;  %2837 = vmatprep.mubr.f32.mxu0 %v4222_v0 }
 0x1ae   :  { %4005 = vmatmul.mubr.msk.f32.vlgmr.msra.gmra.mxu1 %vm1951_vm1, %v3999_v40 }
 0x1af   :  { %2908 = vmatprep.mubr.f32.mxu1 %v4222_v0 }
 0x1c9   :  { %v1446_v45 = vpop.f32.mrf.mxu0 }
 0x1cb   :  { %v1448_v46 = vpop.f32.mrf.mxu0  ;;  %v1517_v47 = vpop.f32.mrf.mxu1 }
 0x1cc   :  { %4007 = vmatprep.subr.msk.mxu0 %vm1955_vm0, %v1448_v46 }
 0x1cd   :  { %v1519_v49 = vpop.f32.mrf.mxu1  ;;  %4008 = vmatpush1.msk.msra.mxu0 %vm1955_vm0, %v1446_v45 }
 0x1ce   :  { %4010 = vmatprep.subr.msk.mxu1 %vm1955_vm0, %v1519_v49  ;;  %4009 = vmatmul.mubr.msk.f32.vlgmr.msra.gmra.mxu0 %vm1951_vm1, %v4006_v48 }
 0x1cf   :  { %4011 = vmatpush1.msk.msra.mxu1 %vm1955_vm0, %v1517_v47  ;;  %3000 = vmatprep.mubr.f32.mxu0 %v4222_v0 }
 0x1d0   :  { %4012 = vmatmul.mubr.msk.f32.vlgmr.msra.gmra.mxu1 %vm1951_vm1, %v4006_v48 }
 0x1d1   :  { %3071 = vmatprep.mubr.f32.mxu1 %v4222_v0 }
 0x1eb   :  { %v1588_v50 = vpop.f32.mrf.mxu0 }
 0x1ed   :  { %v1590_v51 = vpop.f32.mrf.mxu0  ;;  %v1659_v52 = vpop.f32.mrf.mxu1 }
 0x1ee   :  { %4014 = vmatprep.subr.msk.mxu0 %vm1955_vm0, %v1590_v51 }
 0x1ef   :  { %v1661_v54 = vpop.f32.mrf.mxu1  ;;  %4015 = vmatpush1.msk.msra.mxu0 %vm1955_vm0, %v1588_v50 }
 0x1f0   :  { %4017 = vmatprep.subr.msk.mxu1 %vm1955_vm0, %v1661_v54  ;;  %4016 = vmatmul.mubr.msk.f32.vlgmr.msra.gmra.mxu0 %vm1951_vm1, %v4013_v53 }
 0x1f1   :  { %4018 = vmatpush1.msk.msra.mxu1 %vm1955_vm0, %v1659_v52  ;;  %3163 = vmatprep.mubr.f32.mxu0 %v4222_v0 }
 0x1f2   :  { %4019 = vmatmul.mubr.msk.f32.vlgmr.msra.gmra.mxu1 %vm1951_vm1, %v4013_v53 }
 0x1f3   :  { %3234 = vmatprep.mubr.f32.mxu1 %v4222_v0 }
 0x20d   :  { %v1730_v55 = vpop.f32.mrf.mxu0 }
 0x20f   :  { %v1732_v56 = vpop.f32.mrf.mxu0  ;;  %v1801_v57 = vpop.f32.mrf.mxu1 }
 0x210   :  { %4021 = vmatprep.subr.msk.mxu0 %vm1955_vm0, %v1732_v56 }
 0x211   :  { %v1803_v59 = vpop.f32.mrf.mxu1  ;;  %4022 = vmatpush1.msk.msra.mxu0 %vm1955_vm0, %v1730_v55 }
 0x212   :  { %4024 = vmatprep.subr.msk.mxu1 %vm1955_vm0, %v1803_v59  ;;  %4023 = vmatmul.mubr.msk.f32.vlgmr.msra.gmra.mxu0 %vm1951_vm1, %v4020_v58 }
 0x213   :  { %4025 = vmatpush1.msk.msra.mxu1 %vm1955_vm0, %v1801_v57  ;;  %3326 = vmatprep.mubr.f32.mxu0 %v4222_v0 }
 0x214   :  { %4026 = vmatmul.mubr.msk.f32.vlgmr.msra.gmra.mxu1 %vm1951_vm1, %v4020_v58 }
 0x215   :  { %3397 = vmatprep.mubr.f32.mxu1 %v4222_v0 }
 0x230   :  { %v1872_v62 = vpop.f32.mrf.mxu0  ;;  %v1943_v63 = vpop.f32.mrf.mxu1 }
 0x232   :  { %v1874_v1 = vpop.f32.mrf.mxu0  ;;  %v1945_v3 = vpop.f32.mrf.mxu1 }
 0x233   :  { %4028 = vmatprep.subr.msk.mxu0 %vm1955_vm0, %v1874_v1  ;;  %4031 = vmatprep.subr.msk.mxu1 %vm1955_vm0, %v1945_v3 }
 0x234   :  { %4029 = vmatpush1.msk.msra.mxu0 %vm1955_vm0, %v1872_v62  ;;  %4032 = vmatpush1.msk.msra.mxu1 %vm1955_vm0, %v1943_v63  ;;  %v3412_v62 = vpop.permute.xlu0 %3411 }
 0x235   :  { %4030 = vmatmul.mubr.msk.f32.vlgmr.msra.gmra.mxu0 %vm1951_vm1, %v4027_v4  ;;  %4033 = vmatmul.mubr.msk.f32.vlgmr.msra.gmra.mxu1 %vm1951_vm1, %v4027_v4  ;;  %v2034_v8 = vpop.f32.mrf.mxu0  ;;  %v2105_v9 = vpop.f32.mrf.mxu1 }
 0x236   :  { %4034 = vmatprep.subr.msk.mxu0 %vm1955_vm0, %v3471_v5  ;;  %4037 = vmatprep.subr.msk.mxu1 %vm1955_vm0, %v3472_v6 }
 0x237   :  { %4035 = vmatpush1.msk.msra.mxu0 %vm1955_vm0, %v3461_v60  ;;  %3548 = vmatprep.mubr.f32.mxu0 %v4222_v0  ;;  %v2036_v10 = vpop.f32.mrf.mxu0  ;;  %v2107_v11 = vpop.f32.mrf.mxu1 }
 0x238   :  { %4038 = vmatpush1.msk.msra.mxu1 %vm1955_vm0, %v3462_v61  ;;  %3619 = vmatprep.mubr.f32.mxu1 %v4222_v0 }
 0x239   :  { %4036 = vmatmul.mubr.msk.f32.vlgmr.msra.gmra.mxu0 %vm1951_vm1, %v3460_v7  ;;  %4039 = vmatmul.mubr.msk.f32.vlgmr.msra.gmra.mxu1 %vm1951_vm1, %v3460_v7  ;;  %v2191_v13 = vpop.f32.mrf.mxu0  ;;  %v2262_v14 = vpop.f32.mrf.mxu1 }
 0x23a   :  { %3757 = vmatprep.mubr.f32.mxu0 %v4222_v0  ;;  %3828 = vmatprep.mubr.f32.mxu1 %v4222_v0  ;;  %v2192_v27 = vadd.f32 %v2191_v13, %v2034_v8  ;;  %v2263_v28 = vadd.f32 %v2262_v14, %v2105_v9 }
 0x23b   :  { %v2193_v15 = vpop.f32.mrf.mxu0  ;;  %v2264_v16 = vpop.f32.mrf.mxu1 }
 0x23c   :  { %v2194_v29 = vadd.f32 %v2193_v15, %v2036_v10  ;;  %v2265_v30 = vadd.f32 %v2264_v16, %v2107_v11 }
 0x23d   :  { %v2350_v17 = vpop.f32.mrf.mxu0  ;;  %v2421_v18 = vpop.f32.mrf.mxu1 }
 0x23e   :  { %v2426_v32 = vadd.f32 %v2350_v17, %v2192_v27  ;;  %v2428_v33 = vadd.f32 %v2421_v18, %v2263_v28  ;;  %v3467_v17 = vpop.permute.xlu0 %3466 }
 0x23f   :  { %v2352_v19 = vpop.f32.mrf.mxu0  ;;  %v2423_v20 = vpop.f32.mrf.mxu1 }
 0x240   :  { %v2427_v34 = vadd.f32 %v2352_v19, %v2194_v29  ;;  %v2429_v35 = vadd.f32 %v2423_v20, %v2265_v30 }
 0x24a   :  { %v2513_v21 = vpop.f32.mrf.mxu0 }
 0x24b   :  { %v2589_v38 = vadd.f32 %v2513_v21, %v2426_v32 }
 0x24c   :  { %v2584_v22 = vpop.f32.mrf.mxu1  ;;  %v2515_v23 = vpop.f32.mrf.mxu0 }
 0x24d   :  { %v2591_v39 = vadd.f32 %v2584_v22, %v2428_v33  ;;  %v2590_v40 = vadd.f32 %v2515_v23, %v2427_v34 }
 0x24e   :  { %v2586_v24 = vpop.f32.mrf.mxu1 }
 0x24f   :  { %v2592_v41 = vadd.f32 %v2586_v24, %v2429_v35 }
 0x26c   :  { %v2676_v2 = vpop.f32.mrf.mxu0 }
 0x26d   :  { %v2752_v46 = vadd.f32 %v2676_v2, %v2589_v38 }
 0x26e   :  { %v2747_v25 = vpop.f32.mrf.mxu1  ;;  %v2678_v26 = vpop.f32.mrf.mxu0 }
 0x26f   :  { %v2754_v47 = vadd.f32 %v2747_v25, %v2591_v39  ;;  %v2753_v48 = vadd.f32 %v2678_v26, %v2590_v40 }
 0x270   :  { %v2749_v0 = vpop.f32.mrf.mxu1 }
 0x271   :  { %v2755_v49 = vadd.f32 %v2749_v0, %v2592_v41 }
 0x28e   :  { %v2839_v31 = vpop.f32.mrf.mxu0 }
 0x28f   :  { %v2915_v52 = vadd.f32 %v2839_v31, %v2752_v46 }
 0x290   :  { %v2910_v12 = vpop.f32.mrf.mxu1  ;;  %v2841_v36 = vpop.f32.mrf.mxu0 }
 0x291   :  { %v2917_v53 = vadd.f32 %v2910_v12, %v2754_v47  ;;  %v2916_v54 = vadd.f32 %v2841_v36, %v2753_v48  ;;  %v4494_v48 = vld [vmem:[#allocation10] sm:$0x1] }
 0x292   :  { %v2912_v37 = vpop.f32.mrf.mxu1 }
 0x293   :  { %v2918_v55 = vadd.f32 %v2912_v37, %v2755_v49  ;;  %v4224_v49 = vmov 2  }
 0x294   :  { %4057 = vset.pattern.permute.xlu1 %v4224_v49 }
 0x2b0   :  { %v3002_v43 = vpop.f32.mrf.mxu0 }
 0x2b1   :  { %v3078_v58 = vadd.f32 %v3002_v43, %v2915_v52 }
 0x2b2   :  { %v3073_v45 = vpop.f32.mrf.mxu1  ;;  %v3004_v50 = vpop.f32.mrf.mxu0 }
 0x2b3   :  { %v3080_v59 = vadd.f32 %v3073_v45, %v2917_v53  ;;  %v3079_v60 = vadd.f32 %v3004_v50, %v2916_v54  ;;  %v4225_v50 = vmov 1  }
 0x2b4   :  { %v3075_v51 = vpop.f32.mrf.mxu1 }
 0x2b5   :  { %v3081_v61 = vadd.f32 %v3075_v51, %v2918_v55 }
 0x2d2   :  { %v3165_v56 = vpop.f32.mrf.mxu0 }
 0x2d3   :  { %v3241_v3 = vadd.f32 %v3165_v56, %v3078_v58 }
 0x2d4   :  { %v3236_v57 = vpop.f32.mrf.mxu1  ;;  %v3167_v63 = vpop.f32.mrf.mxu0 }
 0x2d5   :  { %v3243_v4 = vadd.f32 %v3236_v57, %v3080_v59  ;;  %v3242_v7 = vadd.f32 %v3167_v63, %v3079_v60 }
 0x2d6   :  { %v3238_v1 = vpop.f32.mrf.mxu1 }
 0x2d7   :  { %v3244_v8 = vadd.f32 %v3238_v1, %v3081_v61 }
 0x2f5   :  { %v3328_v5 = vpop.f32.mrf.mxu0  ;;  %v3399_v6 = vpop.f32.mrf.mxu1 }
 0x2f6   :  { %v3404_v9 = vadd.f32 %v3328_v5, %v3241_v3  ;;  %v3406_v10 = vadd.f32 %v3399_v6, %v3243_v4 }
 0x2f7   :  { %v3330_v11 = vpop.f32.mrf.mxu0  ;;  %v3401_v13 = vpop.f32.mrf.mxu1 }
 0x2f8   :  { %v4459_v14 = vadd.f32 %v3412_v62, %v3404_v9  ;;  %v3405_v15 = vadd.f32 %v3330_v11, %v3242_v7  ;;  %v3407_v16 = vadd.f32 %v3401_v13, %v3244_v8  ;;  %v4461_v19 = vadd.f32 %v3412_v62, %v3406_v10 }
 0x2f9   :  { %v3550_v18 = vpop.f32.mrf.mxu0  ;;  %v3621_v25 = vpop.f32.mrf.mxu1 }
 0x2fa   :  { %v4463_v20 = vadd.f32 %v3412_v62, %v3405_v15  ;;  %v4465_v21 = vadd.f32 %v3550_v18, %v3467_v17  ;;  %v3423_v23 = vmul.f32 %v4459_v14, %v4459_v14  ;;  %v4471_v2 = vadd.f32 %v3412_v62, %v3407_v16 }
 0x2fb   :  { %v3552_v22 = vpop.f32.mrf.mxu0  ;;  %v3425_v29 = vmul.f32 %v4461_v19, %v4461_v19  ;;  %v4485_v12 = vadd.f32 %v3621_v25, %v3467_v17  ;;  %v3623_v33 = vpop.f32.mrf.mxu1 }
 0x2fc   :  { %v3424_v24 = vmul.f32 %v4463_v20, %v4463_v20  ;;  %v4473_v26 = vadd.f32 %v3552_v22, %v3467_v17  ;;  %v3418_v0 = vadd.f32 %v4463_v20, %v4459_v14  ;;  %v3632_v31 = vmul.f32 %v4465_v21, %v4465_v21 }
 0x2fd   :  { %v3426_v34 = vmul.f32 %v4471_v2, %v4471_v2  ;;  %v3634_v40 = vmul.f32 %v4485_v12, %v4485_v12  ;;  %v3624_v41 = vadd.f32 %v3623_v33, %v3467_v17 }
 0x2fe   :  { %v3627_v27 = vadd.f32 %v4473_v26, %v4465_v21  ;;  %v3633_v28 = vmul.f32 %v4473_v26, %v4473_v26  ;;  %v3427_v30 = vadd.f32 %v3424_v24, %v3423_v23  ;;  %v3419_v32 = vadd.f32 %v3418_v0, %v4461_v19 }
 0x2ff   :  { %v3635_v46 = vmul.f32 %v3624_v41, %v3624_v41 }
 0x300   :  { %v3428_v35 = vadd.f32 %v3427_v30, %v3425_v29  ;;  %v3420_v36 = vadd.f32 %v3419_v32, %v4471_v2  ;;  %v3628_v37 = vadd.f32 %v3627_v27, %v4485_v12  ;;  %v3636_v38 = vadd.f32 %v3633_v28, %v3632_v31 }
 0x302   :  { %v3429_v39 = vadd.f32 %v3428_v35, %v3426_v34  ;;  %3421 = vadd.xlane.f32.xlu1 %v3420_v36  ;;  %v3629_v43 = vadd.f32 %v3628_v37, %v3624_v41  ;;  %v3637_v45 = vadd.f32 %v3636_v38, %v3634_v40  ;;  %v3685_v40 = vlaneseq }
 0x304   :  { %3430 = vadd.xlane.f32.xlu0 %v3429_v39  ;;  %v3638_v47 = vadd.f32 %v3637_v45, %v3635_v46  ;;  %v3678_v39 = vld [vmem:[#allocation8] sm:$0x1]  ;;  %vm3952_vm4 = vcmp.lt.s32.totalorder %v3685_v40, 512 }
 0x306   :  { %3630 = vadd.xlane.f32.xlu1 %v3629_v43 }
 0x30a   :  { %3639 = vadd.xlane.f32.xlu1 %v3638_v47 }
 0x31a   :  { %3682 = vperm.xlu0 %4056, %v4494_v48  }
 0x31b   :  { %3453 = vperm.xlu1 %4057, %v4395_v42  }
 0x31f   :  { %4058 = vset.pattern.permute.xlu1 %v4225_v50 }
 0x38b   :  { %v3422_v51 = vpop.xlane.xlu1 %3421 }
 0x38c   :  { %v3432_v52 = vmul.f32 0.001953125, %v3422_v51 }
 0x38d   :  { %v3431_v53 = vpop.xlane.xlu0 %3430 }
 0x38e   :  { %v3433_v54 = vmul.f32 0.001953125, %v3431_v53  ;;  %v3434_v55 = vmul.f32 %v3432_v52, %v3432_v52  ;;  %v3438_v9 = vsub.f32 %v4459_v14, %v3432_v52  ;;  %v3439_v10 = vsub.f32 %v4463_v20, %v3432_v52 }
 0x38f   :  { %v3631_v56 = vpop.xlane.xlu1 %3630  ;;  %v3440_v11 = vsub.f32 %v4461_v19, %v3432_v52  ;;  %v3441_v13 = vsub.f32 %v4471_v2, %v3432_v52 }
 0x390   :  { %v3435_v57 = vsub.f32 %v3433_v54, %v3434_v55  ;;  %v3641_v58 = vmul.f32 0.001953125, %v3631_v56 }
 0x392   :  { %v3436_v59 = vadd.f32 1e-05, %v3435_v57  ;;  %v3643_v61 = vmul.f32 %v3641_v58, %v3641_v58  ;;  %v3647_v22 = vsub.f32 %v4465_v21, %v3641_v58  ;;  %v3648_v23 = vsub.f32 %v4473_v26, %v3641_v58 }
 0x393   :  { %v3640_v60 = vpop.xlane.xlu1 %3639  ;;  %v3650_v24 = vsub.f32 %v3624_v41, %v3641_v58  ;;  %v4511_v41 = vshrl.u32 %v3685_v40, 7 }
 0x394   :  { %4063 = vrsqrt.f32 %v3436_v59  ;;  %v3642_v62 = vmul.f32 0.001953125, %v3640_v60 }
 0x395   :  { %v3687_v43 = vsub.s32 0, %v4511_v41  ;;  %v3683_v45 = vpop.permute.xlu0 %3682 }
 0x396   :  { %v3644_v63 = vsub.f32 %v3642_v62, %v3643_v61 }
 0x397   :  { %v3454_v7 = vpop.permute.xlu1 %3453  ;;  %v3688_v46 = vrot.slane %v3683_v45, %v3687_v43 }
 0x398   :  { %v3645_v1 = vadd.f32 1e-05, %v3644_v63 }
 0x39a   :  { %4065 = vrsqrt.f32 %v3645_v1 }
 0x3a1   :  { %v4064_v3 = vpop.eup %4063 }
 0x3a2   :  { %v3442_v4 = vmul.f32 %v4064_v3, %v4395_v42 }
 0x3a4   :  { %3445 = vperm.xlu1 %4058, %v3442_v4  }
 0x3a7   :  { %v4066_v5 = vpop.eup %4065 }
 0x3a8   :  { %v3651_v6 = vmul.f32 %v4066_v5, %v4401_v44 }
 0x3aa   :  { %3654 = vperm.xlu1 %4058, %v3651_v6  }
 0x3ae   :  { %4059 = vset.pattern.permute.xlu1 %v4224_v49 }
 0x3af   :  { %3663 = vperm.xlu1 %4059, %v4401_v44   ;;  %v3649_v44 = vsub.f32 %v4485_v12, %v3641_v58 }
 0x41f   :  { %v3446_v8 = vpop.permute.xlu1 %3445 }
 0x420   :  { %v3448_v15 = vmul.f32 %v3446_v8, %v3438_v9  ;;  %v3449_v16 = vmul.f32 %v3446_v8, %v3439_v10  ;;  %v3450_v17 = vmul.f32 %v3446_v8, %v3440_v11  ;;  %v3451_v18 = vmul.f32 %v3446_v8, %v3441_v13 }
 0x422   :  { %v3456_v27 = vadd.f32 %v3454_v7, %v3448_v15  ;;  %v3458_v19 = vadd.f32 %v3454_v7, %v3450_v17  ;;  %v3457_v2 = vadd.f32 %v3454_v7, %v3449_v16  ;;  %v3459_v29 = vadd.f32 %v3454_v7, %v3451_v18 }
 0x425   :  { %v3655_v42 = vpop.permute.xlu1 %3654 }
 0x426   :  { %v3657_v25 = vmul.f32 %v3655_v42, %v3647_v22  ;;  %v3658_v14 = vmul.f32 %v3655_v42, %v3648_v23  ;;  %v3659_v0 = vmul.f32 %v3655_v42, %v3649_v44  ;;  %v3660_v20 = vmul.f32 %v3655_v42, %v3650_v24 }
 0x427   :  { %v3871_v42 = vrot.slane %v4494_v48, %v3687_v43 }
 0x42a   :  { %v3664_v28 = vpop.permute.xlu1 %3663 }
 0x42b   :  { %v3666_v30 = vadd.f32 %v3664_v28, %v3657_v25  ;;  %v3667_v31 = vadd.f32 %v3664_v28, %v3658_v14  ;;  %v3668_v32 = vadd.f32 %v3664_v28, %v3659_v0  ;;  %v3669_v33 = vadd.f32 %v3664_v28, %v3660_v20 }
 0x42d   :  { %v3670_v34 = vadd.f32 %v3666_v30, %v3456_v27  ;;  %v3672_v21 = vadd.f32 %v3668_v32, %v3458_v19  ;;  %v3671_v35 = vadd.f32 %v3667_v31, %v3457_v2  ;;  %v3673_v26 = vadd.f32 %v3669_v33, %v3459_v29 }
 0x42f   :  { %v3675_v36 = vmax.f32 %v3671_v35, 0.0  ;;  %v3677_v12 = vmax.f32 %v3673_v26, 0.0  ;;  %v3674_v37 = vmax.f32 %v3670_v34, 0.0  ;;  %v3676_v38 = vmax.f32 %v3672_v21, 0.0 }
 0x431   :  { %3723 = vmatprep.subr.mxu0 %v3675_v36  ;;  %3794 = vmatprep.subr.mxu1 %v3677_v12 }
 0x432   :  { %3724 = vmatpush1.msra.mxu0 %v3674_v37  ;;  %3795 = vmatpush1.msra.mxu1 %v3676_v38 }
 0x433   :  { %4040 = vmatmul.mubr.msk.f32.vlgmr.msra.gmra.mxu0 %vm3689_vm2, %v3678_v39  ;;  %4041 = vmatmul.mubr.msk.f32.vlgmr.msra.gmra.mxu1 %vm3689_vm2, %v3678_v39 }
 0x4f3   :  { %v3759_v47 = vpop.f32.mrf.mxu0  ;;  %v3830_v50 = vpop.f32.mrf.mxu1 }
 0x4f4   :  { %v3760_v51 = vadd.f32 %v3759_v47, %v3688_v46  ;;  %v3831_v52 = vadd.f32 %v3830_v50, %v3688_v46 }
 0x4f5   :  { %v3761_v53 = vpop.f32.mrf.mxu0  ;;  %v3832_v54 = vpop.f32.mrf.mxu1 }
 0x4f6   :  { %v3845_v55 = vmul.f32 %v3760_v51, %v3760_v51  ;;  %v3762_v56 = vadd.f32 %v3761_v53, %v3688_v46  ;;  %v3833_v57 = vadd.f32 %v3832_v54, %v3688_v46  ;;  %v3836_v58 = vsel %vm3835_vm3, %v3760_v51, 0.0 }
 0x4f7   :  { %v3847_v59 = vmul.f32 %v3831_v52, %v3831_v52  ;;  %v3839_v63 = vsel %vm3835_vm3, %v3831_v52, 0.0 }
 0x4f8   :  { %v3837_v60 = vsel %vm3835_vm3, %v3762_v56, 0.0  ;;  %v3846_v61 = vmul.f32 %v3762_v56, %v3762_v56  ;;  %v3848_v1 = vmul.f32 %v3833_v57, %v3833_v57  ;;  %v3849_v3 = vsel %vm3835_vm3, %v3845_v55, 0.0 }
 0x4f9   :  { %v3838_v62 = vadd.f32 %v3837_v60, %v3836_v58  ;;  %v3841_v7 = vsel %vm3835_vm3, %v3833_v57, 0.0  ;;  %v3852_v8 = vsel %vm3835_vm3, %v3847_v59, 0.0  ;;  %v4227_v55 = vmov 1966171168  }
 0x4fa   :  { %v3850_v4 = vsel %vm3835_vm3, %v3846_v61, 0.0  ;;  %v3854_v11 = vsel %vm3835_vm3, %v3848_v1, 0.0 }
 0x4fb   :  { %v3840_v5 = vadd.f32 %v3839_v63, %v3838_v62  ;;  %v3851_v6 = vadd.f32 %v3850_v4, %v3849_v3 }
 0x4fd   :  { %v3842_v9 = vadd.f32 %v3841_v7, %v3840_v5  ;;  %v3853_v10 = vadd.f32 %v3852_v8, %v3851_v6 }
 0x4ff   :  { %3843 = vadd.xlane.f32.xlu1 %v3842_v9  ;;  %v3855_v13 = vadd.f32 %v3854_v11, %v3853_v10 }
 0x501   :  { %3856 = vadd.xlane.f32.xlu0 %v3855_v13 }
 0x510   :  { %3872 = vrot.lane.b32.xlu1 %v3871_v42, %s4226_s5 }
 0x514   :  { %3886 = vperm.xlu1 %4059, %v4494_v48  }
 0x588   :  { %v3844_v15 = vpop.xlane.xlu1 %3843 }
 0x589   :  { %v3858_v16 = vmul.f32 0.001953125, %v3844_v15 }
 0x58a   :  { %v3857_v17 = vpop.xlane.xlu0 %3856 }
 0x58b   :  { %v3859_v18 = vmul.f32 0.001953125, %v3857_v17  ;;  %v3860_v22 = vmul.f32 %v3858_v16, %v3858_v16  ;;  %v3864_v20 = vsub.f32 %v3760_v51, %v3858_v16  ;;  %v3865_v27 = vsub.f32 %v3762_v56, %v3858_v16 }
 0x58c   :  { %v3873_v25 = vpop.permute.xlu1 %3872  ;;  %v3866_v19 = vsub.f32 %v3831_v52, %v3858_v16  ;;  %v3867_v28 = vsub.f32 %v3833_v57, %v3858_v16  ;;  %v3928_v56 = vunpack.c.l.s4 %v4227_v55 }
 0x58d   :  { %v3861_v23 = vsub.f32 %v3859_v18, %v3860_v22 }
 0x58e   :  { %v3929_v57 = vunpack.c.0.s8 %v3928_v56 }
 0x58f   :  { %v3862_v44 = vadd.f32 1e-05, %v3861_v23 }
 0x590   :  { %v3887_v0 = vpop.permute.xlu1 %3886  ;;  %v3932_v59 = vsub.s32 %v3929_v57, %v4511_v41 }
 0x591   :  { %4067 = vrsqrt.f32 %v3862_v44  ;;  %v3892_v48 = vrot.slane %v3887_v0, %v3687_v43 }
 0x59e   :  { %v4068_v24 = vpop.eup %4067 }
 0x59f   :  { %v3875_v14 = vmul.f32 %v4068_v24, %v3873_v25 }
 0x5a1   :  { %3878 = vperm.xlu0 %4056, %v3875_v14  }
 0x5a5   :  { %4060 = vset.pattern.permute.xlu0 %v4224_v49 }
 0x61c   :  { %v3879_v2 = vpop.permute.xlu0 %3878 }
 0x61d   :  { %v3881_v29 = vmul.f32 %v3879_v2, %v3864_v20  ;;  %v3882_v30 = vmul.f32 %v3879_v2, %v3865_v27  ;;  %v3883_v31 = vmul.f32 %v3879_v2, %v3866_v19  ;;  %v3884_v32 = vmul.f32 %v3879_v2, %v3867_v28 }
 0x61f   :  { %v3893_v33 = vadd.f32 %v3892_v48, %v3881_v29  ;;  %v3894_v34 = vadd.f32 %v3892_v48, %v3882_v30  ;;  %v3895_v21 = vadd.f32 %v3892_v48, %v3883_v31  ;;  %v3896_v35 = vadd.f32 %v3892_v48, %v3884_v32 }
 0x621   :  { %v3897_v26 = vsub.f32 0.0, %v3893_v33  ;;  %v3898_v36 = vsub.f32 0.0, %v3894_v34  ;;  %v3899_v12 = vsub.f32 0.0, %v3895_v21  ;;  %v3900_v37 = vsub.f32 0.0, %v3896_v35 }
 0x623   :  { %v3901_v49 = vmul.f32 1.442695, %v3897_v26  ;;  %v3903_v38 = vmul.f32 1.442695, %v3898_v36  ;;  %v3905_v39 = vmul.f32 1.442695, %v3899_v12 }
 0x624   :  { %v3907_v45 = vmul.f32 1.442695, %v3900_v37 }
 0x625   :  { %4069 = vpow2.f32 %v3901_v49 }
 0x626   :  { %4071 = vpow2.f32 %v3903_v38 }
 0x627   :  { %4073 = vpow2.f32 %v3905_v39 }
 0x628   :  { %4075 = vpow2.f32 %v3907_v45 }
 0x632   :  { %v4070_v43 = vpop.eup %4069 }
 0x633   :  { %v4072_v46 = vpop.eup %4071  ;;  %v3909_v47 = vadd.f32 1.0, %v4070_v43 }
 0x634   :  { %v4074_v50 = vpop.eup %4073  ;;  %v3910_v51 = vadd.f32 1.0, %v4072_v46 }
 0x635   :  { %v4076_v52 = vpop.eup %4075  ;;  %v3911_v53 = vadd.f32 1.0, %v4074_v50  ;;  %4077 = vrcp.f32 %v3909_v47 }
 0x636   :  { %v3912_v54 = vadd.f32 1.0, %v4076_v52  ;;  %4079 = vrcp.f32 %v3910_v51 }
 0x637   :  { %4081 = vrcp.f32 %v3911_v53 }
 0x638   :  { %4083 = vrcp.f32 %v3912_v54 }
 0x642   :  { %v4078_v58 = vpop.eup %4077 }
 0x643   :  { %v4080_v60 = vpop.eup %4079 }
 0x644   :  { %v4082_v61 = vpop.eup %4081  ;;  %v3925_v62 = vcombine.low %v4078_v58, %v4080_v60 }
 0x645   :  { %v4084_v63 = vpop.eup %4083 }
 0x646   :  { %v3926_v1 = vcombine.low %v4082_v61, %v4084_v63  ;;  %v3933_v3 = vrot.slane %v3925_v62, %v3932_v59 }
 0x648   :  { %v3940_v4 = vrot.slane %v3926_v1, %v3932_v59 }
 0x64a   :  { %v3941_v5 = vcombine.low %v3933_v3, %v3940_v4 }
 0x64c   :  { %v3948_v6 = vrot.slane %v3941_v5, %v3932_v59 }
 0x64e   :  { %3954 = vst.msk [vmem:[#allocation11] sm:$0xf] %vm3952_vm4, %v3948_v6 }
 0x64f   :  { %4198 = shalt.err (!%p4195_p1)
}
 0x650   :  { %3964 = dma.vmem_to_hbm [thread:$0]  %s3962_s11, 64, %s4539_s9, [#allocation4]  }
 0x651   :  { %4213 = dma.done.wait [#allocation4], 64  }
 0x652   :  { %4214 = vsyncadd [#allocation4], 4294967232 }
 0x653   :  { %3968 = vsyncpa [#allocation3], 1 }
 0x654   :  { %3969 = vsyncpa [#allocation6], 1 }
 0x655   :  { %3970 = vsyncpa [#allocation9], 1 }
 0x656   :  { %3971 = vsyncpa [#allocation4], 1 }

</bundles_post_ra>
